<compile_context>
chip_gen: v5e
topology: v5e:2x2
jax: 0.10.0
libtpu: 0.0.40
codegen_flags: <defaults>
</compile_context>

<pallas_src>
import math

import jax
import jax.numpy as jnp
from jax.experimental import pallas as pl
from jax.experimental.pallas import tpu as pltpu

# ---------------- config ----------------
VOCAB = 100
MAX_POS = 16
D = 64          # hidden size          (DistilBERT: 768)
H = 2           # attention heads      (DistilBERT: 12)
DH = D // H     # head dim
FFN = 128       # FFN inner dim        (DistilBERT: 3072)
LAYERS = 2      # transformer layers   (DistilBERT: 6)
NUM_CLASSES = 4
CPAD = 128      # lane-dense classifier output width (sliced outside)
EPS = 1e-12     # DistilBERT LayerNorm eps

B = 2           # batch
S = 8           # sequence length
T = B * S       # batch collapsed into rows


# ---------------- shared math helpers (used in-kernel and in reference) -----
def _layernorm(x, g, b):
    mu = jnp.mean(x, axis=-1, keepdims=True)
    var = jnp.mean((x - mu) ** 2, axis=-1, keepdims=True)
    return (x - mu) * jax.lax.rsqrt(var + EPS) * g + b


def _gelu(x):
    # TODO(synk): HF DistilBERT uses exact erf-GELU; tanh approximation used
    # here (and in the reference) since erf lowering in Mosaic is not guaranteed.
    c = 0.7978845608028654  # sqrt(2/pi)
    return 0.5 * x * (1.0 + jnp.tanh(c * (x + 0.044715 * x * x * x)))


# ---------------- fused kernel ----------------
def fused_kernel(x_emb_ref, ge_ref, be_ref, bias_ref,
                 wq_ref, bq_ref, wk_ref, bk_ref, wv_ref, bv_ref,
                 wo_ref, bo_ref, g1_ref, b1_ref,
                 wi_ref, bi_ref, wf_ref, bf_ref, g2_ref, b2_ref,
                 wc_ref, bc_ref,
                 out_ref, x_scr):
    l = pl.program_id(0)

    @pl.when(l == 0)
    def _():
        # Embedding LayerNorm once; x stays resident in VMEM scratch after.
        x_scr[...] = _layernorm(x_emb_ref[...], ge_ref[...], be_ref[...])

    x = x_scr[...]                                      # (T, D)
    bias = bias_ref[...]                                # (T, T) block-diag mask

    # ----- multi-head self-attention (per-head weights, unrolled H=2) -----
    attn = None
    for h in range(H):
        q = jnp.dot(x, wq_ref[h], preferred_element_type=jnp.float32) + bq_ref[h]
        k = jnp.dot(x, wk_ref[h], preferred_element_type=jnp.float32) + bk_ref[h]
        v = jnp.dot(x, wv_ref[h], preferred_element_type=jnp.float32) + bv_ref[h]
        # q @ k^T without an explicit transpose (contract head dim on both).
        s = jax.lax.dot_general(q, k, (((1,), (1,)), ((), ())),
                                preferred_element_type=jnp.float32) + bias
        m = jnp.max(s, axis=-1, keepdims=True)
        p = jnp.exp(s - m)
        p = p * pl.reciprocal(jnp.sum(p, axis=-1, keepdims=True), approx=True)
        ctx = jnp.dot(p, v, preferred_element_type=jnp.float32)        # (T, DH)
        # Output projection folded per head: ctx_full @ Wo == sum_h ctx_h @ Wo_h.
        o_h = jnp.dot(ctx, wo_ref[h], preferred_element_type=jnp.float32)
        attn = o_h if attn is None else attn + o_h
    attn = attn + bo_ref[...]

    x1 = _layernorm(x + attn, g1_ref[...], b1_ref[...])                # sa_layer_norm

    # ----- FFN -----
    h1 = _gelu(jnp.dot(x1, wi_ref[...], preferred_element_type=jnp.float32)
               + bi_ref[...])
    h2 = jnp.dot(h1, wf_ref[...], preferred_element_type=jnp.float32) + bf_ref[...]
    x2 = _layernorm(x1 + h2, g2_ref[...], b2_ref[...])                 # output_layer_norm

    x_scr[...] = x2

    @pl.when(l == pl.num_programs(0) - 1)
    def _():
        # Classifier on all tokens into a lane-dense (T, 128) slab; the
        # wrapper picks the CLS rows and slices to NUM_CLASSES.
        out_ref[...] = (jnp.dot(x2, wc_ref[...],
                                preferred_element_type=jnp.float32)
                        + bc_ref[...])


# ---------------- pallas_call wrapper ----------------
_FUSED_ORDER = ("wq", "bq", "wk", "bk", "wv", "bv", "wo", "bo",
                "g1", "b1", "w_in", "b_in", "w_out", "b_out", "g2", "b2")


def _const_spec(shape):
    nd = len(shape)
    return pl.BlockSpec(shape, lambda l, _nd=nd: (0,) * _nd)


def _layer_spec(arr):
    # Leading [LAYERS] dim squeezed away; index_map selects this layer's slab.
    shape = tuple(arr.shape)
    nd = len(shape)
    return pl.BlockSpec((None,) + shape[1:],
                        lambda l, _nd=nd: (l,) + (0,) * (_nd - 1))


def distilbert_forward(input_ids, params):
    Bn, Sn = input_ids.shape
    Tn = Bn * Sn

    # Embedding gather (plain-JAX glue) — word + position embeddings.
    x = (params["word_emb"][input_ids]
         + params["pos_emb"][jnp.arange(Sn)][None, :, :]).astype(jnp.float32)
    x = x.reshape(Tn, D)

    # Block-diagonal attention bias so collapsed batches don't attend across.
    batch_id = jnp.repeat(jnp.arange(Bn), Sn)
    attn_bias = jnp.where(batch_id[:, None] == batch_id[None, :],
                          0.0, -1e30).astype(jnp.float32)

    fp = params["fused"]
    layer_args = [fp[k] for k in _FUSED_ORDER]

    out = pl.pallas_call(
        fused_kernel,
        out_shape=jax.ShapeDtypeStruct((Tn, CPAD), jnp.float32),
        grid=(LAYERS,),
        in_specs=([_const_spec((Tn, D)),
                   _const_spec((1, D)),
                   _const_spec((1, D)),
                   _const_spec((Tn, Tn))]
                  + [_layer_spec(a) for a in layer_args]
                  + [_const_spec((D, CPAD)),
                     _const_spec((1, CPAD))]),
        out_specs=_const_spec((Tn, CPAD)),
        scratch_shapes=[pltpu.VMEM((Tn, D), jnp.float32)],
        compiler_params=pltpu.CompilerParams(
            dimension_semantics=("arbitrary",)),
    )(x, params["emb_ln_g"], params["emb_ln_b"], attn_bias,
      *layer_args, params["cls_w_pad"], params["cls_b_pad"])

    logits_all = out.reshape(Bn, Sn, CPAD)
    return logits_all[:, 0, :NUM_CLASSES]       # hidden_state[:, 0] -> classifier


# ---------------- parameters ----------------
def init_params(key):
    keys = iter(jax.random.split(key, 8 + LAYERS * 8))

    def nrm(shape, std=0.02):
        return jax.random.normal(next(keys), shape, jnp.float32) * std

    params = {
        "word_emb": nrm((VOCAB, D)),
        "pos_emb": nrm((MAX_POS, D)),
        "emb_ln_g": jnp.ones((1, D), jnp.float32),
        "emb_ln_b": jnp.zeros((1, D), jnp.float32),
        # classifier: nn.init.normal_(weight, std=0.02); normal_(bias, 0) (std=1)
        "cls_w": nrm((D, NUM_CLASSES), std=0.02),
        "cls_b": jax.random.normal(next(keys), (1, NUM_CLASSES), jnp.float32),
    }
    layers = []
    for _ in range(LAYERS):
        layers.append({
            "wq": nrm((D, D)), "bq": jnp.zeros((1, D), jnp.float32),
            "wk": nrm((D, D)), "bk": jnp.zeros((1, D), jnp.float32),
            "wv": nrm((D, D)), "bv": jnp.zeros((1, D), jnp.float32),
            "wo": nrm((D, D)), "bo": jnp.zeros((1, D), jnp.float32),
            "g1": jnp.ones((1, D), jnp.float32), "b1": jnp.zeros((1, D), jnp.float32),
            "w_in": nrm((D, FFN)), "b_in": jnp.zeros((1, FFN), jnp.float32),
            "w_out": nrm((FFN, D)), "b_out": jnp.zeros((1, D), jnp.float32),
            "g2": jnp.ones((1, D), jnp.float32), "b2": jnp.zeros((1, D), jnp.float32),
        })
    params["layers"] = layers
    return params


def prepare_params(params):
    """Stack per-layer weights, split Q/K/V/O per head, fold 1/sqrt(DH)."""
    scale = 1.0 / math.sqrt(DH)

    def split_w(w):                       # (D, D_out) -> (H, D, DH)
        return w.reshape(D, H, DH).transpose(1, 0, 2)

    def split_b(b):                       # (1, D) -> (H, 1, DH)
        return b.reshape(H, DH)[:, None, :]

    def stk(fn):
        return jnp.stack([fn(lyr) for lyr in params["layers"]], axis=0)

    fused = {
        "wq": stk(lambda l: split_w(l["wq"]) * scale),
        "bq": stk(lambda l: split_b(l["bq"]) * scale),
        "wk": stk(lambda l: split_w(l["wk"])),
        "bk": stk(lambda l: split_b(l["bk"])),
        "wv": stk(lambda l: split_w(l["wv"])),
        "bv": stk(lambda l: split_b(l["bv"])),
        "wo": stk(lambda l: l["wo"].reshape(H, DH, D)),   # rows h*DH:(h+1)*DH
        "bo": stk(lambda l: l["bo"]),
        "g1": stk(lambda l: l["g1"]), "b1": stk(lambda l: l["b1"]),
        "w_in": stk(lambda l: l["w_in"]), "b_in": stk(lambda l: l["b_in"]),
        "w_out": stk(lambda l: l["w_out"]), "b_out": stk(lambda l: l["b_out"]),
        "g2": stk(lambda l: l["g2"]), "b2": stk(lambda l: l["b2"]),
    }
    out = dict(params)
    out["fused"] = fused
    out["cls_w_pad"] = jnp.zeros((D, CPAD), jnp.float32).at[:, :NUM_CLASSES].set(params["cls_w"])
    out["cls_b_pad"] = jnp.zeros((1, CPAD), jnp.float32).at[:, :NUM_CLASSES].set(params["cls_b"])
    return out


# ---------------- pure-JAX reference (for correctness check) ----------------
def reference_forward(input_ids, params):
    Bn, Sn = input_ids.shape
    x = params["word_emb"][input_ids] + params["pos_emb"][jnp.arange(Sn)][None]
    x = _layernorm(x, params["emb_ln_g"], params["emb_ln_b"])
    for lyr in params["layers"]:
        q = (x @ lyr["wq"] + lyr["bq"]).reshape(Bn, Sn, H, DH).transpose(0, 2, 1, 3)
        k = (x @ lyr["wk"] + lyr["bk"]).reshape(Bn, Sn, H, DH).transpose(0, 2, 1, 3)
        v = (x @ lyr["wv"] + lyr["bv"]).reshape(Bn, Sn, H, DH).transpose(0, 2, 1, 3)
        s = jnp.einsum('bhqd,bhkd->bhqk', q, k) / math.sqrt(DH)
        p = jax.nn.softmax(s, axis=-1)
        ctx = jnp.einsum('bhqk,bhkd->bhqd', p, v).transpose(0, 2, 1, 3).reshape(Bn, Sn, D)
        attn = ctx @ lyr["wo"] + lyr["bo"]
        x1 = _layernorm(x + attn, lyr["g1"], lyr["b1"])
        h1 = _gelu(x1 @ lyr["w_in"] + lyr["b_in"])
        h2 = h1 @ lyr["w_out"] + lyr["b_out"]
        x = _layernorm(x1 + h2, lyr["g2"], lyr["b2"])
    pooled = x[:, 0]
    return pooled @ params["cls_w"] + params["cls_b"]


# ---------------- main ----------------
if __name__ == "__main__":
    key = jax.random.PRNGKey(0)
    k_param, k_ids = jax.random.split(key)
    params = prepare_params(init_params(k_param))
    input_ids = jax.random.randint(k_ids, (B, S), 0, VOCAB, dtype=jnp.int32)

    logits = jax.jit(distilbert_forward)(input_ids, params)
    jax.block_until_ready(logits)
    assert logits.shape == (B, NUM_CLASSES) and logits.dtype == jnp.float32

    ref = reference_forward(input_ids, params)
    err = float(jnp.max(jnp.abs(logits - ref)))
    assert err < 5e-2, f"kernel/reference mismatch: {err}"
    print("KERNEL_OK")
</pallas_src>

<mosaic_0001>
module attributes {stable_mosaic.version = 11 : i64} {
  func.func @fused_kernel(%arg0: i32, %arg1: memref<16x64xf32, #tpu.memory_space<vmem>>, %arg2: memref<1x64xf32, #tpu.memory_space<vmem>>, %arg3: memref<1x64xf32, #tpu.memory_space<vmem>>, %arg4: memref<16x16xf32, #tpu.memory_space<vmem>>, %arg5: memref<1x2x64x32xf32, #tpu.memory_space<vmem>>, %arg6: memref<1x2x1x32xf32, #tpu.memory_space<vmem>>, %arg7: memref<1x2x64x32xf32, #tpu.memory_space<vmem>>, %arg8: memref<1x2x1x32xf32, #tpu.memory_space<vmem>>, %arg9: memref<1x2x64x32xf32, #tpu.memory_space<vmem>>, %arg10: memref<1x2x1x32xf32, #tpu.memory_space<vmem>>, %arg11: memref<1x2x32x64xf32, #tpu.memory_space<vmem>>, %arg12: memref<1x1x64xf32, #tpu.memory_space<vmem>>, %arg13: memref<1x1x64xf32, #tpu.memory_space<vmem>>, %arg14: memref<1x1x64xf32, #tpu.memory_space<vmem>>, %arg15: memref<1x64x128xf32, #tpu.memory_space<vmem>>, %arg16: memref<1x1x128xf32, #tpu.memory_space<vmem>>, %arg17: memref<1x128x64xf32, #tpu.memory_space<vmem>>, %arg18: memref<1x1x64xf32, #tpu.memory_space<vmem>>, %arg19: memref<1x1x64xf32, #tpu.memory_space<vmem>>, %arg20: memref<1x1x64xf32, #tpu.memory_space<vmem>>, %arg21: memref<64x128xf32, #tpu.memory_space<vmem>>, %arg22: memref<1x128xf32, #tpu.memory_space<vmem>>, %arg23: memref<16x128xf32, #tpu.memory_space<vmem>>, %arg24: memref<16x64xf32, #tpu.memory_space<vmem>>) attributes {dimension_semantics = [#tpu.dimension_semantics<arbitrary>], iteration_bounds = array<i64: 2>, scalar_prefetch = 0 : i64, scratch_operands = 1 : i64, tpu.core_type = #tpu.core_type<tc>, window_params = [{pipeline_mode = #tpu.pipeline_mode<synchronous>, transform_indices = @transform_0, window_bounds = array<i64: 16, 64>}, {pipeline_mode = #tpu.pipeline_mode<synchronous>, transform_indices = @transform_1, window_bounds = array<i64: 1, 64>}, {pipeline_mode = #tpu.pipeline_mode<synchronous>, transform_indices = @transform_2, window_bounds = array<i64: 1, 64>}, {pipeline_mode = #tpu.pipeline_mode<synchronous>, transform_indices = @transform_3, window_bounds = array<i64: 16, 16>}, {transform_indices = @transform_4, window_bounds = array<i64: 1, 2, 64, 32>}, {transform_indices = @transform_5, window_bounds = array<i64: 1, 2, 1, 32>}, {transform_indices = @transform_6, window_bounds = array<i64: 1, 2, 64, 32>}, {transform_indices = @transform_7, window_bounds = array<i64: 1, 2, 1, 32>}, {transform_indices = @transform_8, window_bounds = array<i64: 1, 2, 64, 32>}, {transform_indices = @transform_9, window_bounds = array<i64: 1, 2, 1, 32>}, {transform_indices = @transform_10, window_bounds = array<i64: 1, 2, 32, 64>}, {transform_indices = @transform_11, window_bounds = array<i64: 1, 1, 64>}, {transform_indices = @transform_12, window_bounds = array<i64: 1, 1, 64>}, {transform_indices = @transform_13, window_bounds = array<i64: 1, 1, 64>}, {transform_indices = @transform_14, window_bounds = array<i64: 1, 64, 128>}, {transform_indices = @transform_15, window_bounds = array<i64: 1, 1, 128>}, {transform_indices = @transform_16, window_bounds = array<i64: 1, 128, 64>}, {transform_indices = @transform_17, window_bounds = array<i64: 1, 1, 64>}, {transform_indices = @transform_18, window_bounds = array<i64: 1, 1, 64>}, {transform_indices = @transform_19, window_bounds = array<i64: 1, 1, 64>}, {pipeline_mode = #tpu.pipeline_mode<synchronous>, transform_indices = @transform_20, window_bounds = array<i64: 64, 128>}, {pipeline_mode = #tpu.pipeline_mode<synchronous>, transform_indices = @transform_21, window_bounds = array<i64: 1, 128>}, {pipeline_mode = #tpu.pipeline_mode<synchronous>, transform_indices = @transform_22, window_bounds = array<i64: 16, 128>}]} {
    %c0_i32 = arith.constant 0 : i32
    %0 = arith.cmpi eq, %arg0, %c0_i32 : i32
    %1 = arith.extui %0 : i1 to i32
    %c0_i32_0 = arith.constant 0 : i32
    %2 = arith.cmpi ne, %1, %c0_i32_0 : i32
    scf.if %2 {
      %c0_120 = arith.constant 0 : index
      %c0_121 = arith.constant 0 : index
      %169 = vector.load %arg1[%c0_120, %c0_121] : memref<16x64xf32, #tpu.memory_space<vmem>>, vector<16x64xf32>
      %c0_122 = arith.constant 0 : index
      %c0_123 = arith.constant 0 : index
      %170 = vector.load %arg2[%c0_122, %c0_123] : memref<1x64xf32, #tpu.memory_space<vmem>>, vector<1x64xf32>
      %c0_124 = arith.constant 0 : index
      %c0_125 = arith.constant 0 : index
      %171 = vector.load %arg3[%c0_124, %c0_125] : memref<1x64xf32, #tpu.memory_space<vmem>>, vector<1x64xf32>
      %cst_126 = arith.constant dense<0.000000e+00> : vector<16xf32>
      %172 = vector.multi_reduction <add>, %169, %cst_126 [1] : vector<16x64xf32> to vector<16xf32>
      %173 = vector.shape_cast %172 : vector<16xf32> to vector<16x1xf32>
      %cst_127 = arith.constant 6.400000e+01 : f32
      %174 = vector.broadcast %cst_127 : f32 to vector<16x1xf32>
      %175 = arith.divf %173, %174 : vector<16x1xf32>
      %176 = vector.broadcast %175 : vector<16x1xf32> to vector<16x64xf32>
      %177 = arith.subf %169, %176 : vector<16x64xf32>
      %178 = arith.mulf %177, %177 : vector<16x64xf32>
      %cst_128 = arith.constant dense<0.000000e+00> : vector<16xf32>
      %179 = vector.multi_reduction <add>, %178, %cst_128 [1] : vector<16x64xf32> to vector<16xf32>
      %180 = vector.shape_cast %179 : vector<16xf32> to vector<16x1xf32>
      %cst_129 = arith.constant 6.400000e+01 : f32
      %181 = vector.broadcast %cst_129 : f32 to vector<16x1xf32>
      %182 = arith.divf %180, %181 : vector<16x1xf32>
      %183 = vector.broadcast %175 : vector<16x1xf32> to vector<16x64xf32>
      %184 = arith.subf %169, %183 : vector<16x64xf32>
      %cst_130 = arith.constant 9.99999996E-13 : f32
      %185 = vector.broadcast %cst_130 : f32 to vector<16x1xf32>
      %186 = arith.addf %182, %185 : vector<16x1xf32>
      %187 = math.rsqrt %186 : vector<16x1xf32>
      %188 = vector.broadcast %187 : vector<16x1xf32> to vector<16x64xf32>
      %189 = arith.mulf %184, %188 : vector<16x64xf32>
      %190 = vector.broadcast %170 : vector<1x64xf32> to vector<16x64xf32>
      %191 = arith.mulf %189, %190 : vector<16x64xf32>
      %192 = vector.broadcast %171 : vector<1x64xf32> to vector<16x64xf32>
      %193 = arith.addf %191, %192 : vector<16x64xf32>
      %c0_131 = arith.constant 0 : index
      %c0_132 = arith.constant 0 : index
      %194 = vector.load %arg24[%c0_131, %c0_132] : memref<16x64xf32, #tpu.memory_space<vmem>>, vector<16x64xf32>
      tpu.vector_store %arg24[%c0_131, %c0_132], %193 {strides = array<i32>} : memref<16x64xf32, #tpu.memory_space<vmem>>, vector<16x64xf32>,
    } else {
    }
    %c0 = arith.constant 0 : index
    %c0_1 = arith.constant 0 : index
    %3 = vector.load %arg24[%c0, %c0_1] : memref<16x64xf32, #tpu.memory_space<vmem>>, vector<16x64xf32>
    %c0_2 = arith.constant 0 : index
    %c0_3 = arith.constant 0 : index
    %4 = vector.load %arg4[%c0_2, %c0_3] : memref<16x16xf32, #tpu.memory_space<vmem>>, vector<16x16xf32>
    %c0_4 = arith.constant 0 : index
    %c0_5 = arith.constant 0 : index
    %c0_6 = arith.constant 0 : index
    %c0_7 = arith.constant 0 : index
    %5 = vector.load %arg5[%c0_4, %c0_5, %c0_6, %c0_7] : memref<1x2x64x32xf32, #tpu.memory_space<vmem>>, vector<1x1x64x32xf32>
    %6 = vector.shape_cast %5 : vector<1x1x64x32xf32> to vector<64x32xf32>
    %cst = arith.constant dense<0.000000e+00> : vector<16x32xf32>
    %7 = tpu.matmul %3, %6, %cst {dimension_numbers = #tpu.dot_dimension_numbers<[1], [0], [0], [1], [0, 0, 1, 1], [], []>} : vector<16x64xf32>, vector<64x32xf32>, vector<16x32xf32> -> vector<16x32xf32>
    %c0_8 = arith.constant 0 : index
    %c0_9 = arith.constant 0 : index
    %c0_10 = arith.constant 0 : index
    %c0_11 = arith.constant 0 : index
    %8 = vector.load %arg6[%c0_8, %c0_9, %c0_10, %c0_11] : memref<1x2x1x32xf32, #tpu.memory_space<vmem>>, vector<1x1x1x32xf32>
    %9 = vector.shape_cast %8 : vector<1x1x1x32xf32> to vector<1x32xf32>
    %10 = vector.broadcast %9 : vector<1x32xf32> to vector<16x32xf32>
    %11 = arith.addf %7, %10 : vector<16x32xf32>
    %c0_12 = arith.constant 0 : index
    %c0_13 = arith.constant 0 : index
    %c0_14 = arith.constant 0 : index
    %c0_15 = arith.constant 0 : index
    %12 = vector.load %arg7[%c0_12, %c0_13, %c0_14, %c0_15] : memref<1x2x64x32xf32, #tpu.memory_space<vmem>>, vector<1x1x64x32xf32>
    %13 = vector.shape_cast %12 : vector<1x1x64x32xf32> to vector<64x32xf32>
    %cst_16 = arith.constant dense<0.000000e+00> : vector<16x32xf32>
    %14 = tpu.matmul %3, %13, %cst_16 {dimension_numbers = #tpu.dot_dimension_numbers<[1], [0], [0], [1], [0, 0, 1, 1], [], []>} : vector<16x64xf32>, vector<64x32xf32>, vector<16x32xf32> -> vector<16x32xf32>
    %c0_17 = arith.constant 0 : index
    %c0_18 = arith.constant 0 : index
    %c0_19 = arith.constant 0 : index
    %c0_20 = arith.constant 0 : index
    %15 = vector.load %arg8[%c0_17, %c0_18, %c0_19, %c0_20] : memref<1x2x1x32xf32, #tpu.memory_space<vmem>>, vector<1x1x1x32xf32>
    %16 = vector.shape_cast %15 : vector<1x1x1x32xf32> to vector<1x32xf32>
    %17 = vector.broadcast %16 : vector<1x32xf32> to vector<16x32xf32>
    %18 = arith.addf %14, %17 : vector<16x32xf32>
    %c0_21 = arith.constant 0 : index
    %c0_22 = arith.constant 0 : index
    %c0_23 = arith.constant 0 : index
    %c0_24 = arith.constant 0 : index
    %19 = vector.load %arg9[%c0_21, %c0_22, %c0_23, %c0_24] : memref<1x2x64x32xf32, #tpu.memory_space<vmem>>, vector<1x1x64x32xf32>
    %20 = vector.shape_cast %19 : vector<1x1x64x32xf32> to vector<64x32xf32>
    %cst_25 = arith.constant dense<0.000000e+00> : vector<16x32xf32>
    %21 = tpu.matmul %3, %20, %cst_25 {dimension_numbers = #tpu.dot_dimension_numbers<[1], [0], [0], [1], [0, 0, 1, 1], [], []>} : vector<16x64xf32>, vector<64x32xf32>, vector<16x32xf32> -> vector<16x32xf32>
    %c0_26 = arith.constant 0 : index
    %c0_27 = arith.constant 0 : index
    %c0_28 = arith.constant 0 : index
    %c0_29 = arith.constant 0 : index
    %22 = vector.load %arg10[%c0_26, %c0_27, %c0_28, %c0_29] : memref<1x2x1x32xf32, #tpu.memory_space<vmem>>, vector<1x1x1x32xf32>
    %23 = vector.shape_cast %22 : vector<1x1x1x32xf32> to vector<1x32xf32>
    %24 = vector.broadcast %23 : vector<1x32xf32> to vector<16x32xf32>
    %25 = arith.addf %21, %24 : vector<16x32xf32>
    %cst_30 = arith.constant dense<0.000000e+00> : vector<16x16xf32>
    %26 = tpu.matmul %11, %18, %cst_30 {dimension_numbers = #tpu.dot_dimension_numbers<[1], [1], [0], [0], [0, 0, 1, 0], [], []>} : vector<16x32xf32>, vector<16x32xf32>, vector<16x16xf32> -> vector<16x16xf32>
    %27 = arith.addf %26, %4 : vector<16x16xf32>
    %cst_31 = arith.constant dense<0xFF800000> : vector<16xf32>
    %28 = vector.multi_reduction <maximumf>, %27, %cst_31 [1] : vector<16x16xf32> to vector<16xf32>
    %29 = vector.shape_cast %28 : vector<16xf32> to vector<16x1xf32>
    %30 = vector.broadcast %29 : vector<16x1xf32> to vector<16x16xf32>
    %31 = arith.subf %27, %30 : vector<16x16xf32>
    %32 = math.exp %31 : vector<16x16xf32>
    %cst_32 = arith.constant dense<0.000000e+00> : vector<16xf32>
    %33 = vector.multi_reduction <add>, %32, %cst_32 [1] : vector<16x16xf32> to vector<16xf32>
    %34 = vector.shape_cast %33 : vector<16xf32> to vector<16x1xf32>
    %35 = tpu.reciprocal %34 {approx = true} : vector<16x1xf32> -> vector<16x1xf32>
    %36 = vector.broadcast %35 : vector<16x1xf32> to vector<16x16xf32>
    %37 = arith.mulf %32, %36 : vector<16x16xf32>
    %cst_33 = arith.constant dense<0.000000e+00> : vector<16x32xf32>
    %38 = tpu.matmul %37, %25, %cst_33 {dimension_numbers = #tpu.dot_dimension_numbers<[1], [0], [0], [1], [0, 0, 1, 1], [], []>} : vector<16x16xf32>, vector<16x32xf32>, vector<16x32xf32> -> vector<16x32xf32>
    %c0_34 = arith.constant 0 : index
    %c0_35 = arith.constant 0 : index
    %c0_36 = arith.constant 0 : index
    %c0_37 = arith.constant 0 : index
    %39 = vector.load %arg11[%c0_34, %c0_35, %c0_36, %c0_37] : memref<1x2x32x64xf32, #tpu.memory_space<vmem>>, vector<1x1x32x64xf32>
    %40 = vector.shape_cast %39 : vector<1x1x32x64xf32> to vector<32x64xf32>
    %cst_38 = arith.constant dense<0.000000e+00> : vector<16x64xf32>
    %41 = tpu.matmul %38, %40, %cst_38 {dimension_numbers = #tpu.dot_dimension_numbers<[1], [0], [0], [1], [0, 0, 1, 1], [], []>} : vector<16x32xf32>, vector<32x64xf32>, vector<16x64xf32> -> vector<16x64xf32>
    %c0_39 = arith.constant 0 : index
    %c1 = arith.constant 1 : index
    %c0_40 = arith.constant 0 : index
    %c0_41 = arith.constant 0 : index
    %42 = vector.load %arg5[%c0_39, %c1, %c0_40, %c0_41] : memref<1x2x64x32xf32, #tpu.memory_space<vmem>>, vector<1x1x64x32xf32>
    %43 = vector.shape_cast %42 : vector<1x1x64x32xf32> to vector<64x32xf32>
    %cst_42 = arith.constant dense<0.000000e+00> : vector<16x32xf32>
    %44 = tpu.matmul %3, %43, %cst_42 {dimension_numbers = #tpu.dot_dimension_numbers<[1], [0], [0], [1], [0, 0, 1, 1], [], []>} : vector<16x64xf32>, vector<64x32xf32>, vector<16x32xf32> -> vector<16x32xf32>
    %c0_43 = arith.constant 0 : index
    %c1_44 = arith.constant 1 : index
    %c0_45 = arith.constant 0 : index
    %c0_46 = arith.constant 0 : index
    %45 = vector.load %arg6[%c0_43, %c1_44, %c0_45, %c0_46] : memref<1x2x1x32xf32, #tpu.memory_space<vmem>>, vector<1x1x1x32xf32>
    %46 = vector.shape_cast %45 : vector<1x1x1x32xf32> to vector<1x32xf32>
    %47 = vector.broadcast %46 : vector<1x32xf32> to vector<16x32xf32>
    %48 = arith.addf %44, %47 : vector<16x32xf32>
    %c0_47 = arith.constant 0 : index
    %c1_48 = arith.constant 1 : index
    %c0_49 = arith.constant 0 : index
    %c0_50 = arith.constant 0 : index
    %49 = vector.load %arg7[%c0_47, %c1_48, %c0_49, %c0_50] : memref<1x2x64x32xf32, #tpu.memory_space<vmem>>, vector<1x1x64x32xf32>
    %50 = vector.shape_cast %49 : vector<1x1x64x32xf32> to vector<64x32xf32>
    %cst_51 = arith.constant dense<0.000000e+00> : vector<16x32xf32>
    %51 = tpu.matmul %3, %50, %cst_51 {dimension_numbers = #tpu.dot_dimension_numbers<[1], [0], [0], [1], [0, 0, 1, 1], [], []>} : vector<16x64xf32>, vector<64x32xf32>, vector<16x32xf32> -> vector<16x32xf32>
    %c0_52 = arith.constant 0 : index
    %c1_53 = arith.constant 1 : index
    %c0_54 = arith.constant 0 : index
    %c0_55 = arith.constant 0 : index
    %52 = vector.load %arg8[%c0_52, %c1_53, %c0_54, %c0_55] : memref<1x2x1x32xf32, #tpu.memory_space<vmem>>, vector<1x1x1x32xf32>
    %53 = vector.shape_cast %52 : vector<1x1x1x32xf32> to vector<1x32xf32>
    %54 = vector.broadcast %53 : vector<1x32xf32> to vector<16x32xf32>
    %55 = arith.addf %51, %54 : vector<16x32xf32>
    %c0_56 = arith.constant 0 : index
    %c1_57 = arith.constant 1 : index
    %c0_58 = arith.constant 0 : index
    %c0_59 = arith.constant 0 : index
    %56 = vector.load %arg9[%c0_56, %c1_57, %c0_58, %c0_59] : memref<1x2x64x32xf32, #tpu.memory_space<vmem>>, vector<1x1x64x32xf32>
    %57 = vector.shape_cast %56 : vector<1x1x64x32xf32> to vector<64x32xf32>
    %cst_60 = arith.constant dense<0.000000e+00> : vector<16x32xf32>
    %58 = tpu.matmul %3, %57, %cst_60 {dimension_numbers = #tpu.dot_dimension_numbers<[1], [0], [0], [1], [0, 0, 1, 1], [], []>} : vector<16x64xf32>, vector<64x32xf32>, vector<16x32xf32> -> vector<16x32xf32>
    %c0_61 = arith.constant 0 : index
    %c1_62 = arith.constant 1 : index
    %c0_63 = arith.constant 0 : index
    %c0_64 = arith.constant 0 : index
    %59 = vector.load %arg10[%c0_61, %c1_62, %c0_63, %c0_64] : memref<1x2x1x32xf32, #tpu.memory_space<vmem>>, vector<1x1x1x32xf32>
    %60 = vector.shape_cast %59 : vector<1x1x1x32xf32> to vector<1x32xf32>
    %61 = vector.broadcast %60 : vector<1x32xf32> to vector<16x32xf32>
    %62 = arith.addf %58, %61 : vector<16x32xf32>
    %cst_65 = arith.constant dense<0.000000e+00> : vector<16x16xf32>
    %63 = tpu.matmul %48, %55, %cst_65 {dimension_numbers = #tpu.dot_dimension_numbers<[1], [1], [0], [0], [0, 0, 1, 0], [], []>} : vector<16x32xf32>, vector<16x32xf32>, vector<16x16xf32> -> vector<16x16xf32>
    %64 = arith.addf %63, %4 : vector<16x16xf32>
    %cst_66 = arith.constant dense<0xFF800000> : vector<16xf32>
    %65 = vector.multi_reduction <maximumf>, %64, %cst_66 [1] : vector<16x16xf32> to vector<16xf32>
    %66 = vector.shape_cast %65 : vector<16xf32> to vector<16x1xf32>
    %67 = vector.broadcast %66 : vector<16x1xf32> to vector<16x16xf32>
    %68 = arith.subf %64, %67 : vector<16x16xf32>
    %69 = math.exp %68 : vector<16x16xf32>
    %cst_67 = arith.constant dense<0.000000e+00> : vector<16xf32>
    %70 = vector.multi_reduction <add>, %69, %cst_67 [1] : vector<16x16xf32> to vector<16xf32>
    %71 = vector.shape_cast %70 : vector<16xf32> to vector<16x1xf32>
    %72 = tpu.reciprocal %71 {approx = true} : vector<16x1xf32> -> vector<16x1xf32>
    %73 = vector.broadcast %72 : vector<16x1xf32> to vector<16x16xf32>
    %74 = arith.mulf %69, %73 : vector<16x16xf32>
    %cst_68 = arith.constant dense<0.000000e+00> : vector<16x32xf32>
    %75 = tpu.matmul %74, %62, %cst_68 {dimension_numbers = #tpu.dot_dimension_numbers<[1], [0], [0], [1], [0, 0, 1, 1], [], []>} : vector<16x16xf32>, vector<16x32xf32>, vector<16x32xf32> -> vector<16x32xf32>
    %c0_69 = arith.constant 0 : index
    %c1_70 = arith.constant 1 : index
    %c0_71 = arith.constant 0 : index
    %c0_72 = arith.constant 0 : index
    %76 = vector.load %arg11[%c0_69, %c1_70, %c0_71, %c0_72] : memref<1x2x32x64xf32, #tpu.memory_space<vmem>>, vector<1x1x32x64xf32>
    %77 = vector.shape_cast %76 : vector<1x1x32x64xf32> to vector<32x64xf32>
    %cst_73 = arith.constant dense<0.000000e+00> : vector<16x64xf32>
    %78 = tpu.matmul %75, %77, %cst_73 {dimension_numbers = #tpu.dot_dimension_numbers<[1], [0], [0], [1], [0, 0, 1, 1], [], []>} : vector<16x32xf32>, vector<32x64xf32>, vector<16x64xf32> -> vector<16x64xf32>
    %79 = arith.addf %41, %78 : vector<16x64xf32>
    %c0_74 = arith.constant 0 : index
    %c0_75 = arith.constant 0 : index
    %c0_76 = arith.constant 0 : index
    %80 = vector.load %arg12[%c0_74, %c0_75, %c0_76] : memref<1x1x64xf32, #tpu.memory_space<vmem>>, vector<1x1x64xf32>
    %81 = vector.shape_cast %80 : vector<1x1x64xf32> to vector<1x64xf32>
    %82 = vector.broadcast %81 : vector<1x64xf32> to vector<16x64xf32>
    %83 = arith.addf %79, %82 : vector<16x64xf32>
    %84 = arith.addf %3, %83 : vector<16x64xf32>
    %c0_77 = arith.constant 0 : index
    %c0_78 = arith.constant 0 : index
    %c0_79 = arith.constant 0 : index
    %85 = vector.load %arg13[%c0_77, %c0_78, %c0_79] : memref<1x1x64xf32, #tpu.memory_space<vmem>>, vector<1x1x64xf32>
    %86 = vector.shape_cast %85 : vector<1x1x64xf32> to vector<1x64xf32>
    %c0_80 = arith.constant 0 : index
    %c0_81 = arith.constant 0 : index
    %c0_82 = arith.constant 0 : index
    %87 = vector.load %arg14[%c0_80, %c0_81, %c0_82] : memref<1x1x64xf32, #tpu.memory_space<vmem>>, vector<1x1x64xf32>
    %88 = vector.shape_cast %87 : vector<1x1x64xf32> to vector<1x64xf32>
    %cst_83 = arith.constant dense<0.000000e+00> : vector<16xf32>
    %89 = vector.multi_reduction <add>, %84, %cst_83 [1] : vector<16x64xf32> to vector<16xf32>
    %90 = vector.shape_cast %89 : vector<16xf32> to vector<16x1xf32>
    %cst_84 = arith.constant 6.400000e+01 : f32
    %91 = vector.broadcast %cst_84 : f32 to vector<16x1xf32>
    %92 = arith.divf %90, %91 : vector<16x1xf32>
    %93 = vector.broadcast %92 : vector<16x1xf32> to vector<16x64xf32>
    %94 = arith.subf %84, %93 : vector<16x64xf32>
    %95 = arith.mulf %94, %94 : vector<16x64xf32>
    %cst_85 = arith.constant dense<0.000000e+00> : vector<16xf32>
    %96 = vector.multi_reduction <add>, %95, %cst_85 [1] : vector<16x64xf32> to vector<16xf32>
    %97 = vector.shape_cast %96 : vector<16xf32> to vector<16x1xf32>
    %cst_86 = arith.constant 6.400000e+01 : f32
    %98 = vector.broadcast %cst_86 : f32 to vector<16x1xf32>
    %99 = arith.divf %97, %98 : vector<16x1xf32>
    %100 = vector.broadcast %92 : vector<16x1xf32> to vector<16x64xf32>
    %101 = arith.subf %84, %100 : vector<16x64xf32>
    %cst_87 = arith.constant 9.99999996E-13 : f32
    %102 = vector.broadcast %cst_87 : f32 to vector<16x1xf32>
    %103 = arith.addf %99, %102 : vector<16x1xf32>
    %104 = math.rsqrt %103 : vector<16x1xf32>
    %105 = vector.broadcast %104 : vector<16x1xf32> to vector<16x64xf32>
    %106 = arith.mulf %101, %105 : vector<16x64xf32>
    %107 = vector.broadcast %86 : vector<1x64xf32> to vector<16x64xf32>
    %108 = arith.mulf %106, %107 : vector<16x64xf32>
    %109 = vector.broadcast %88 : vector<1x64xf32> to vector<16x64xf32>
    %110 = arith.addf %108, %109 : vector<16x64xf32>
    %c0_88 = arith.constant 0 : index
    %c0_89 = arith.constant 0 : index
    %c0_90 = arith.constant 0 : index
    %111 = vector.load %arg15[%c0_88, %c0_89, %c0_90] : memref<1x64x128xf32, #tpu.memory_space<vmem>>, vector<1x64x128xf32>
    %112 = vector.shape_cast %111 : vector<1x64x128xf32> to vector<64x128xf32>
    %cst_91 = arith.constant dense<0.000000e+00> : vector<16x128xf32>
    %113 = tpu.matmul %110, %112, %cst_91 {dimension_numbers = #tpu.dot_dimension_numbers<[1], [0], [0], [1], [0, 0, 1, 1], [], []>} : vector<16x64xf32>, vector<64x128xf32>, vector<16x128xf32> -> vector<16x128xf32>
    %c0_92 = arith.constant 0 : index
    %c0_93 = arith.constant 0 : index
    %c0_94 = arith.constant 0 : index
    %114 = vector.load %arg16[%c0_92, %c0_93, %c0_94] : memref<1x1x128xf32, #tpu.memory_space<vmem>>, vector<1x1x128xf32>
    %115 = vector.shape_cast %114 : vector<1x1x128xf32> to vector<1x128xf32>
    %116 = vector.broadcast %115 : vector<1x128xf32> to vector<16x128xf32>
    %117 = arith.addf %113, %116 : vector<16x128xf32>
    %cst_95 = arith.constant 5.000000e-01 : f32
    %118 = vector.broadcast %cst_95 : f32 to vector<16x128xf32>
    %119 = arith.mulf %118, %117 : vector<16x128xf32>
    %cst_96 = arith.constant 4.471500e-02 : f32
    %120 = vector.broadcast %cst_96 : f32 to vector<16x128xf32>
    %121 = arith.mulf %120, %117 : vector<16x128xf32>
    %122 = arith.mulf %121, %117 : vector<16x128xf32>
    %123 = arith.mulf %122, %117 : vector<16x128xf32>
    %124 = arith.addf %117, %123 : vector<16x128xf32>
    %cst_97 = arith.constant 0.797884583 : f32
    %125 = vector.broadcast %cst_97 : f32 to vector<16x128xf32>
    %126 = arith.mulf %125, %124 : vector<16x128xf32>
    %127 = math.tanh %126 : vector<16x128xf32>
    %cst_98 = arith.constant 1.000000e+00 : f32
    %128 = vector.broadcast %cst_98 : f32 to vector<16x128xf32>
    %129 = arith.addf %128, %127 : vector<16x128xf32>
    %130 = arith.mulf %119, %129 : vector<16x128xf32>
    %c0_99 = arith.constant 0 : index
    %c0_100 = arith.constant 0 : index
    %c0_101 = arith.constant 0 : index
    %131 = vector.load %arg17[%c0_99, %c0_100, %c0_101] : memref<1x128x64xf32, #tpu.memory_space<vmem>>, vector<1x128x64xf32>
    %132 = vector.shape_cast %131 : vector<1x128x64xf32> to vector<128x64xf32>
    %cst_102 = arith.constant dense<0.000000e+00> : vector<16x64xf32>
    %133 = tpu.matmul %130, %132, %cst_102 {dimension_numbers = #tpu.dot_dimension_numbers<[1], [0], [0], [1], [0, 0, 1, 1], [], []>} : vector<16x128xf32>, vector<128x64xf32>, vector<16x64xf32> -> vector<16x64xf32>
    %c0_103 = arith.constant 0 : index
    %c0_104 = arith.constant 0 : index
    %c0_105 = arith.constant 0 : index
    %134 = vector.load %arg18[%c0_103, %c0_104, %c0_105] : memref<1x1x64xf32, #tpu.memory_space<vmem>>, vector<1x1x64xf32>
    %135 = vector.shape_cast %134 : vector<1x1x64xf32> to vector<1x64xf32>
    %136 = vector.broadcast %135 : vector<1x64xf32> to vector<16x64xf32>
    %137 = arith.addf %133, %136 : vector<16x64xf32>
    %138 = arith.addf %110, %137 : vector<16x64xf32>
    %c0_106 = arith.constant 0 : index
    %c0_107 = arith.constant 0 : index
    %c0_108 = arith.constant 0 : index
    %139 = vector.load %arg19[%c0_106, %c0_107, %c0_108] : memref<1x1x64xf32, #tpu.memory_space<vmem>>, vector<1x1x64xf32>
    %140 = vector.shape_cast %139 : vector<1x1x64xf32> to vector<1x64xf32>
    %c0_109 = arith.constant 0 : index
    %c0_110 = arith.constant 0 : index
    %c0_111 = arith.constant 0 : index
    %141 = vector.load %arg20[%c0_109, %c0_110, %c0_111] : memref<1x1x64xf32, #tpu.memory_space<vmem>>, vector<1x1x64xf32>
    %142 = vector.shape_cast %141 : vector<1x1x64xf32> to vector<1x64xf32>
    %cst_112 = arith.constant dense<0.000000e+00> : vector<16xf32>
    %143 = vector.multi_reduction <add>, %138, %cst_112 [1] : vector<16x64xf32> to vector<16xf32>
    %144 = vector.shape_cast %143 : vector<16xf32> to vector<16x1xf32>
    %cst_113 = arith.constant 6.400000e+01 : f32
    %145 = vector.broadcast %cst_113 : f32 to vector<16x1xf32>
    %146 = arith.divf %144, %145 : vector<16x1xf32>
    %147 = vector.broadcast %146 : vector<16x1xf32> to vector<16x64xf32>
    %148 = arith.subf %138, %147 : vector<16x64xf32>
    %149 = arith.mulf %148, %148 : vector<16x64xf32>
    %cst_114 = arith.constant dense<0.000000e+00> : vector<16xf32>
    %150 = vector.multi_reduction <add>, %149, %cst_114 [1] : vector<16x64xf32> to vector<16xf32>
    %151 = vector.shape_cast %150 : vector<16xf32> to vector<16x1xf32>
    %cst_115 = arith.constant 6.400000e+01 : f32
    %152 = vector.broadcast %cst_115 : f32 to vector<16x1xf32>
    %153 = arith.divf %151, %152 : vector<16x1xf32>
    %154 = vector.broadcast %146 : vector<16x1xf32> to vector<16x64xf32>
    %155 = arith.subf %138, %154 : vector<16x64xf32>
    %cst_116 = arith.constant 9.99999996E-13 : f32
    %156 = vector.broadcast %cst_116 : f32 to vector<16x1xf32>
    %157 = arith.addf %153, %156 : vector<16x1xf32>
    %158 = math.rsqrt %157 : vector<16x1xf32>
    %159 = vector.broadcast %158 : vector<16x1xf32> to vector<16x64xf32>
    %160 = arith.mulf %155, %159 : vector<16x64xf32>
    %161 = vector.broadcast %140 : vector<1x64xf32> to vector<16x64xf32>
    %162 = arith.mulf %160, %161 : vector<16x64xf32>
    %163 = vector.broadcast %142 : vector<1x64xf32> to vector<16x64xf32>
    %164 = arith.addf %162, %163 : vector<16x64xf32>
    %c0_117 = arith.constant 0 : index
    %c0_118 = arith.constant 0 : index
    %165 = vector.load %arg24[%c0_117, %c0_118] : memref<16x64xf32, #tpu.memory_space<vmem>>, vector<16x64xf32>
    tpu.vector_store %arg24[%c0_117, %c0_118], %164 {strides = array<i32>} : memref<16x64xf32, #tpu.memory_space<vmem>>, vector<16x64xf32>,
    %c1_i32 = arith.constant 1 : i32
    %166 = arith.cmpi eq, %arg0, %c1_i32 : i32
    %167 = arith.extui %166 : i1 to i32
    %c0_i32_119 = arith.constant 0 : i32
    %168 = arith.cmpi ne, %167, %c0_i32_119 : i32
    scf.if %168 {
      %c0_120 = arith.constant 0 : index
      %c0_121 = arith.constant 0 : index
      %169 = vector.load %arg21[%c0_120, %c0_121] : memref<64x128xf32, #tpu.memory_space<vmem>>, vector<64x128xf32>
      %cst_122 = arith.constant dense<0.000000e+00> : vector<16x128xf32>
      %170 = tpu.matmul %164, %169, %cst_122 {dimension_numbers = #tpu.dot_dimension_numbers<[1], [0], [0], [1], [0, 0, 1, 1], [], []>} : vector<16x64xf32>, vector<64x128xf32>, vector<16x128xf32> -> vector<16x128xf32>
      %c0_123 = arith.constant 0 : index
      %c0_124 = arith.constant 0 : index
      %171 = vector.load %arg22[%c0_123, %c0_124] : memref<1x128xf32, #tpu.memory_space<vmem>>, vector<1x128xf32>
      %172 = vector.broadcast %171 : vector<1x128xf32> to vector<16x128xf32>
      %173 = arith.addf %170, %172 : vector<16x128xf32>
      %c0_125 = arith.constant 0 : index
      %c0_126 = arith.constant 0 : index
      %174 = vector.load %arg23[%c0_125, %c0_126] : memref<16x128xf32, #tpu.memory_space<vmem>>, vector<16x128xf32>
      tpu.vector_store %arg23[%c0_125, %c0_126], %173 {strides = array<i32>} : memref<16x128xf32, #tpu.memory_space<vmem>>, vector<16x128xf32>,
    } else {
    }
    return
  }
  func.func @transform_0(%arg0: i32) -> (i32, i32) {
    %c0_i32 = arith.constant 0 : i32
    %c0_i32_0 = arith.constant 0 : i32
    %c0_i32_1 = arith.constant 0 : i32
    return %c0_i32, %c0_i32_0 : i32, i32
  }
  func.func @transform_1(%arg0: i32) -> (i32, i32) {
    %c0_i32 = arith.constant 0 : i32
    %c0_i32_0 = arith.constant 0 : i32
    %c0_i32_1 = arith.constant 0 : i32
    return %c0_i32, %c0_i32_0 : i32, i32
  }
  func.func @transform_2(%arg0: i32) -> (i32, i32) {
    %c0_i32 = arith.constant 0 : i32
    %c0_i32_0 = arith.constant 0 : i32
    %c0_i32_1 = arith.constant 0 : i32
    return %c0_i32, %c0_i32_0 : i32, i32
  }
  func.func @transform_3(%arg0: i32) -> (i32, i32) {
    %c0_i32 = arith.constant 0 : i32
    %c0_i32_0 = arith.constant 0 : i32
    %c0_i32_1 = arith.constant 0 : i32
    return %c0_i32, %c0_i32_0 : i32, i32
  }
  func.func @transform_4(%arg0: i32) -> (i32, i32, i32, i32) {
    %c0_i32 = arith.constant 0 : i32
    %c0_i32_0 = arith.constant 0 : i32
    %c0_i32_1 = arith.constant 0 : i32
    %c0_i32_2 = arith.constant 0 : i32
    return %arg0, %c0_i32, %c0_i32_0, %c0_i32_1 : i32, i32, i32, i32
  }
  func.func @transform_5(%arg0: i32) -> (i32, i32, i32, i32) {
    %c0_i32 = arith.constant 0 : i32
    %c0_i32_0 = arith.constant 0 : i32
    %c0_i32_1 = arith.constant 0 : i32
    %c0_i32_2 = arith.constant 0 : i32
    return %arg0, %c0_i32, %c0_i32_0, %c0_i32_1 : i32, i32, i32, i32
  }
  func.func @transform_6(%arg0: i32) -> (i32, i32, i32, i32) {
    %c0_i32 = arith.constant 0 : i32
    %c0_i32_0 = arith.constant 0 : i32
    %c0_i32_1 = arith.constant 0 : i32
    %c0_i32_2 = arith.constant 0 : i32
    return %arg0, %c0_i32, %c0_i32_0, %c0_i32_1 : i32, i32, i32, i32
  }
  func.func @transform_7(%arg0: i32) -> (i32, i32, i32, i32) {
    %c0_i32 = arith.constant 0 : i32
    %c0_i32_0 = arith.constant 0 : i32
    %c0_i32_1 = arith.constant 0 : i32
    %c0_i32_2 = arith.constant 0 : i32
    return %arg0, %c0_i32, %c0_i32_0, %c0_i32_1 : i32, i32, i32, i32
  }
  func.func @transform_8(%arg0: i32) -> (i32, i32, i32, i32) {
    %c0_i32 = arith.constant 0 : i32
    %c0_i32_0 = arith.constant 0 : i32
    %c0_i32_1 = arith.constant 0 : i32
    %c0_i32_2 = arith.constant 0 : i32
    return %arg0, %c0_i32, %c0_i32_0, %c0_i32_1 : i32, i32, i32, i32
  }
  func.func @transform_9(%arg0: i32) -> (i32, i32, i32, i32) {
    %c0_i32 = arith.constant 0 : i32
    %c0_i32_0 = arith.constant 0 : i32
    %c0_i32_1 = arith.constant 0 : i32
    %c0_i32_2 = arith.constant 0 : i32
    return %arg0, %c0_i32, %c0_i32_0, %c0_i32_1 : i32, i32, i32, i32
  }
  func.func @transform_10(%arg0: i32) -> (i32, i32, i32, i32) {
    %c0_i32 = arith.constant 0 : i32
    %c0_i32_0 = arith.constant 0 : i32
    %c0_i32_1 = arith.constant 0 : i32
    %c0_i32_2 = arith.constant 0 : i32
    return %arg0, %c0_i32, %c0_i32_0, %c0_i32_1 : i32, i32, i32, i32
  }
  func.func @transform_11(%arg0: i32) -> (i32, i32, i32) {
    %c0_i32 = arith.constant 0 : i32
    %c0_i32_0 = arith.constant 0 : i32
    %c0_i32_1 = arith.constant 0 : i32
    return %arg0, %c0_i32, %c0_i32_0 : i32, i32, i32
  }
  func.func @transform_12(%arg0: i32) -> (i32, i32, i32) {
    %c0_i32 = arith.constant 0 : i32
    %c0_i32_0 = arith.constant 0 : i32
    %c0_i32_1 = arith.constant 0 : i32
    return %arg0, %c0_i32, %c0_i32_0 : i32, i32, i32
  }
  func.func @transform_13(%arg0: i32) -> (i32, i32, i32) {
    %c0_i32 = arith.constant 0 : i32
    %c0_i32_0 = arith.constant 0 : i32
    %c0_i32_1 = arith.constant 0 : i32
    return %arg0, %c0_i32, %c0_i32_0 : i32, i32, i32
  }
  func.func @transform_14(%arg0: i32) -> (i32, i32, i32) {
    %c0_i32 = arith.constant 0 : i32
    %c0_i32_0 = arith.constant 0 : i32
    %c0_i32_1 = arith.constant 0 : i32
    return %arg0, %c0_i32, %c0_i32_0 : i32, i32, i32
  }
  func.func @transform_15(%arg0: i32) -> (i32, i32, i32) {
    %c0_i32 = arith.constant 0 : i32
    %c0_i32_0 = arith.constant 0 : i32
    %c0_i32_1 = arith.constant 0 : i32
    return %arg0, %c0_i32, %c0_i32_0 : i32, i32, i32
  }
  func.func @transform_16(%arg0: i32) -> (i32, i32, i32) {
    %c0_i32 = arith.constant 0 : i32
    %c0_i32_0 = arith.constant 0 : i32
    %c0_i32_1 = arith.constant 0 : i32
    return %arg0, %c0_i32, %c0_i32_0 : i32, i32, i32
  }
  func.func @transform_17(%arg0: i32) -> (i32, i32, i32) {
    %c0_i32 = arith.constant 0 : i32
    %c0_i32_0 = arith.constant 0 : i32
    %c0_i32_1 = arith.constant 0 : i32
    return %arg0, %c0_i32, %c0_i32_0 : i32, i32, i32
  }
  func.func @transform_18(%arg0: i32) -> (i32, i32, i32) {
    %c0_i32 = arith.constant 0 : i32
    %c0_i32_0 = arith.constant 0 : i32
    %c0_i32_1 = arith.constant 0 : i32
    return %arg0, %c0_i32, %c0_i32_0 : i32, i32, i32
  }
  func.func @transform_19(%arg0: i32) -> (i32, i32, i32) {
    %c0_i32 = arith.constant 0 : i32
    %c0_i32_0 = arith.constant 0 : i32
    %c0_i32_1 = arith.constant 0 : i32
    return %arg0, %c0_i32, %c0_i32_0 : i32, i32, i32
  }
  func.func @transform_20(%arg0: i32) -> (i32, i32) {
    %c0_i32 = arith.constant 0 : i32
    %c0_i32_0 = arith.constant 0 : i32
    %c0_i32_1 = arith.constant 0 : i32
    return %c0_i32, %c0_i32_0 : i32, i32
  }
  func.func @transform_21(%arg0: i32) -> (i32, i32) {
    %c0_i32 = arith.constant 0 : i32
    %c0_i32_0 = arith.constant 0 : i32
    %c0_i32_1 = arith.constant 0 : i32
    return %c0_i32, %c0_i32_0 : i32, i32
  }
  func.func @transform_22(%arg0: i32) -> (i32, i32) {
    %c0_i32 = arith.constant 0 : i32
    %c0_i32_0 = arith.constant 0 : i32
    %c0_i32_1 = arith.constant 0 : i32
    return %c0_i32, %c0_i32_0 : i32, i32
  }
}

</mosaic_0001>

<bundles_post_ra>
// kernel: distilbert_forward.1
= control target key start
LH: loop header
LB: loop body
LE: loop exit
PB: predicated region body
PF: predicated region fallthrough
CT: control target
= control target key end

     0   :  { %s2580_s0 = inlined_call_operand.vmem [shape: f32[16,64], index: 0, kind: input, shape index: {}]   ;;  %s2581_s1 = inlined_call_operand.vmem [shape: f32[1,64], index: 1, kind: input, shape index: {}]   ;;  %s2582_s2 = inlined_call_operand.vmem [shape: f32[1,64], index: 2, kind: input, shape index: {}]   ;;  %s2583_s3 = inlined_call_operand.vmem [shape: f32[16,16], index: 3, kind: input, shape index: {}]   ;;  %s2584_s4 = inlined_call_operand.vmem [shape: f32[2,2,64,32], index: 4, kind: input, shape index: {}]   ;;  %s2585_s5 = inlined_call_operand.vmem [shape: f32[2,2,1,32], index: 5, kind: input, shape index: {}]   ;;  %s2586_s6 = inlined_call_operand.vmem [shape: f32[2,2,64,32], index: 6, kind: input, shape index: {}]   ;;  %s2587_s7 = inlined_call_operand.vmem [shape: f32[2,2,1,32], index: 7, kind: input, shape index: {}]   ;;  %s2588_s8 = inlined_call_operand.vmem [shape: f32[2,2,64,32], index: 8, kind: input, shape index: {}]   ;;  %s2589_s9 = inlined_call_operand.vmem [shape: f32[2,2,1,32], index: 9, kind: input, shape index: {}]   ;;  %s2590_s10 = inlined_call_operand.vmem [shape: f32[2,2,32,64], index: 10, kind: input, shape index: {}]   ;;  %s2591_s11 = inlined_call_operand.vmem [shape: f32[2,1,64], index: 11, kind: input, shape index: {}]   ;;  %s2592_s12 = inlined_call_operand.vmem [shape: f32[2,1,64], index: 12, kind: input, shape index: {}]   ;;  %s2593_s13 = inlined_call_operand.vmem [shape: f32[2,1,64], index: 13, kind: input, shape index: {}]   ;;  %s2594_s14 = inlined_call_operand.vmem [shape: f32[2,64,128], index: 14, kind: input, shape index: {}]   ;;  %s2595_s15 = inlined_call_operand.vmem [shape: f32[2,1,128], index: 15, kind: input, shape index: {}]   ;;  %s2596_s16 = inlined_call_operand.vmem [shape: f32[2,128,64], index: 16, kind: input, shape index: {}]   ;;  %s2597_s17 = inlined_call_operand.vmem [shape: f32[2,1,64], index: 17, kind: input, shape index: {}]   ;;  %s2598_s18 = inlined_call_operand.vmem [shape: f32[2,1,64], index: 18, kind: input, shape index: {}]   ;;  %s2599_s19 = inlined_call_operand.vmem [shape: f32[2,1,64], index: 19, kind: input, shape index: {}]   ;;  %s2600_s20 = inlined_call_operand.vmem [shape: f32[64,128], index: 20, kind: input, shape index: {}]   ;;  %s2601_s21 = inlined_call_operand.vmem [shape: f32[1,128], index: 21, kind: input, shape index: {}]   ;;  %s2602_s22 = inlined_call_operand.vmem [shape: f32[16,128], index: 22, kind: output, shape index: {}]  }
   0x1   :  { %2612 = sst [smem:[#allocation8_spill]] %s2580_s0 }
   0x2   :  { %2613 = sst [smem:[#allocation9_spill]] %s2581_s1 }
   0x3   :  { %2614 = sst [smem:[#allocation10_spill]] %s2582_s2 }
   0x4   :  { %2615 = sst [smem:[#allocation11_spill]] %s2583_s3  ;;  %s2212_s3 = smov 0  }
   0x5   :  { %2616 = sst [smem:[#allocation12_spill]] %s2584_s4 }
   0x6   :  { %2617 = sst [smem:[#allocation13_spill]] %s2585_s5 }
   0x7   :  { %2618 = sst [smem:[#allocation14_spill]] %s2586_s6 }
   0x8   :  { %2619 = sst [smem:[#allocation15_spill]] %s2587_s7 }
   0x9   :  { %2620 = sst [smem:[#allocation16_spill]] %s2588_s8 }
   0xa   :  { %2621 = sst [smem:[#allocation17_spill]] %s2589_s9 }
   0xb   :  { %2622 = sst [smem:[#allocation18_spill]] %s2590_s10 }
   0xc   :  { %2623 = sst [smem:[#allocation19_spill]] %s2594_s14 }
   0xd   :  { %2624 = sst [smem:[#allocation20_spill]] %s2600_s20 }
   0xe   :  { %2625 = sst [smem:[#allocation21_spill]] %s2601_s21 }
   0xf   :  { %2626 = sst [smem:[#allocation22_spill]] %s2602_s22 }
  0x10 LB: > { %2627 = sst [smem:[#allocation3_spill]] %s2093_s3  ;;  %s2218_s28 = sadd.s32 4294967295, %s2093_s3   ;;  %s2093_s3 = sphi %s2212_s3, %s32_s3  }
  0x11   : > { %2628 = sst [smem:[#allocation4_spill]] %s2218_s28  ;;  %p1928_p0 = scmp.ge.s32.totalorder %s2093_s3, 1 }
  0x12   : > { %p740_p1 = scmp.lt.s32.totalorder %s2093_s3, 3 }
  0x14   : > { %p741_p2 = pnand %p1928_p0, %p740_p1 }
  0x16   : > { %744 = sbr.rel (%p741_p2) target bundleno = 2543 (0x9ef), region = 108 }
  0x1b   : > { %p855_p3 = scmp.lt.s32.totalorder %s2218_s28, 1  ;;  %s2629_s1 = sld [smem:[#allocation12_spill]] }
  0x1c   : > { %s2631_s25 = sld [smem:[#allocation13_spill]] }
  0x1d   : > { %s2224_s29 = scalar_select %p855_p3, %s2218_s28, 1 }
  0x1e   : > { %s2633_s3 = sld [smem:[#allocation14_spill]] }
  0x1f   : > { %s2011_s30 = sshll.u32 %s2224_s29, 7  ;;  %s1931_s4 = sshll.u32 %s2224_s29, 1 }
  0x20   : > { %s2635_s7 = sld [smem:[#allocation15_spill]]  ;;  %s911_s0 = scalar_lea.vmem %s2597_s17, %s2224_s29 }
  0x21   : > { %s2231_s5 = scalar_lea.vmem %s2629_s1, %s2011_s30  ;;  %s2636_s8 = sld [smem:[#allocation16_spill]] }
  0x22   : > { %2630 = sst [smem:[#allocation5_spill]] %s2231_s5  ;;  %s2236_s26 = scalar_lea.vmem %s2631_s25, %s1931_s4 }
  0x23   : > { %2632 = sst [smem:[#allocation6_spill]] %s2236_s26  ;;  %s2014_s25 = sshll.u32 %s2224_s29, 6 }
  0x24   : > { %s2241_s22 = scalar_lea.vmem %s2633_s3, %s2011_s30  ;;  %s2637_s9 = sld [smem:[#allocation17_spill]] }
  0x25   : > { %2634 = sst [smem:[#allocation7_spill]] %s2241_s22  ;;  %s903_s3 = scalar_lea.vmem %s2595_s15, %s2224_s29 }
  0x26   : > { %s2246_s28 = scalar_lea.vmem %s2635_s7, %s1931_s4  ;;  %s2638_s10 = sld [smem:[#allocation18_spill]] }
  0x27   : > { %s2251_s1 = scalar_lea.vmem %s2636_s8, %s2011_s30  ;;  %s2639_s14 = sld [smem:[#allocation19_spill]] }
  0x28   : > { %s914_s5 = scalar_lea.vmem %s2598_s18, %s2224_s29  ;;  %s917_s24 = scalar_lea.vmem %s2599_s19, %s2224_s29 }
  0x2a   : > { %s2256_s6 = scalar_lea.vmem %s2637_s9, %s1931_s4 }
  0x2c   : > { %s2266_s20 = scalar_lea.vmem %s2638_s10, %s2014_s25  ;;  %s2288_s10 = scalar_lea.vmem %s2596_s16, %s2011_s30 }
  0x2d   : > { %s2279_s9 = scalar_lea.vmem %s2639_s14, %s2014_s25  ;;  %s2640_s14 = sld [smem:[#allocation4_spill]] }
  0x33   : > { %p1944_p4 = scmp.ne.s32.totalorder %s2640_s14, 0 }
  0x34   : > { %s2641_s22 = sld [smem:[#allocation8_spill]] (!%p1944_p4) }
  0x35   : > { %921 = sbr.rel (%p1944_p4) target bundleno = 336 (0x150), region = 112  ;;  %s2642_s21 = sld [smem:[#allocation9_spill]] (!%p1944_p4) }
  0x36   : > { %s2643_s4 = sld [smem:[#allocation10_spill]] (!%p1944_p4) }
  0x3a   : > { %v922_v0 = vld [vmem:[%s2641_s22] sm:$0xff]  ;;  %vm926_vm0 = vcmask 523264   ;;  %v923_v2 = vld [vmem:[%s2641_s22 + $0x8] sm:$0xff]  ;;  %v2095_v4 = vmov 64.0  }
  0x3b   : > { %v927_v1 = vsel %vm926_vm0, %v922_v0, 0.0  ;;  %v930_v3 = vsel %vm926_vm0, %v923_v2, 0.0  ;;  %2037 = vrcp.f32 %v2095_v4  ;;  %v2035_v35 = vld [vmem:[%s2642_s21] ss:$0 sm:$0xff] }
  0x3c   : > { %928 = vadd.xlane.f32.xlu0 %v927_v1  ;;  %v2036_v38 = vld [vmem:[%s2643_s4] ss:$0 sm:$0xff] }
  0x41   : > { %v2038_v5 = vpop.eup %2037 }
  0x42   : > { %v934_v6 = vmul.f32 64.0, %v2038_v5  ;;  %vm938_vm1 = vweird.f32 %v2038_v5 }
  0x44   : > { %931 = vadd.xlane.f32.xlu0 %v930_v3  ;;  %v935_v7 = vsub.f32 1.0, %v934_v6 }
  0x46   : > { %v936_v8 = vmul.f32 %v2038_v5, %v935_v7 }
  0x48   : > { %v937_v9 = vadd.f32 %v2038_v5, %v936_v8 }
  0x4a   : > { %v939_v10 = vsel %vm938_vm1, %v2038_v5, %v937_v9 }
  0xaf   : > { %v929_v11 = vpop.xlane.xlu0 %928 }
  0xb0   : > { %v940_v12 = vmul.f32 %v939_v10, %v929_v11 }
  0xb2   : > { %v942_v13 = vsub.f32 %v922_v0, %v940_v12 }
  0xb4   : > { %v944_v14 = vmul.f32 %v942_v13, %v942_v13 }
  0xb6   : > { %v946_v15 = vsel %vm926_vm0, %v944_v14, 0.0 }
  0xb7   : > { %947 = vadd.xlane.f32.xlu1 %v946_v15  ;;  %v932_v16 = vpop.xlane.xlu0 %931 }
  0xb8   : > { %v941_v17 = vmul.f32 %v939_v10, %v932_v16 }
  0xba   : > { %v943_v18 = vsub.f32 %v923_v2, %v941_v17 }
  0xbc   : > { %v945_v19 = vmul.f32 %v943_v18, %v943_v18 }
  0xbe   : > { %v949_v20 = vsel %vm926_vm0, %v945_v19, 0.0 }
  0xbf   : > { %950 = vadd.xlane.f32.xlu1 %v949_v20 }
 0x12a   : > { %v948_v21 = vpop.xlane.xlu1 %947 }
 0x12b   : > { %v952_v22 = vmul.f32 %v948_v21, %v939_v10 }
 0x12d   : > { %v954_v23 = vadd.f32 1e-12, %v952_v22 }
 0x12f   : > { %2039 = vrsqrt.f32 %v954_v23  ;;  %vm962_vm3 = vweird.f32 %v954_v23 }
 0x132   : > { %v951_v24 = vpop.xlane.xlu1 %950 }
 0x133   : > { %v953_v25 = vmul.f32 %v951_v24, %v939_v10 }
 0x135   : > { %v2040_v26 = vpop.eup %2039  ;;  %v955_v27 = vadd.f32 1e-12, %v953_v25 }
 0x136   : > { %v957_v28 = vmul.f32 %v2040_v26, %v954_v23  ;;  %vm963_vm2 = vweird.f32 %v2040_v26 }
 0x137   : > { %2041 = vrsqrt.f32 %v955_v27  ;;  %vm964_vm4 = vmor %vm962_vm3, %vm963_vm2  ;;  %vm972_vm6 = vweird.f32 %v955_v27 }
 0x138   : > { %v958_v29 = vmul.f32 %v2040_v26, %v957_v28 }
 0x13a   : > { %v959_v30 = vmul.f32 0.5, %v958_v29 }
 0x13c   : > { %v960_v31 = vsub.f32 1.5, %v959_v30 }
 0x13d   : > { %v2042_v32 = vpop.eup %2041 }
 0x13e   : > { %v961_v33 = vmul.f32 %v2040_v26, %v960_v31  ;;  %v967_v34 = vmul.f32 %v2042_v32, %v955_v27  ;;  %vm973_vm5 = vweird.f32 %v2042_v32 }
 0x13f   : > { %vm974_vm7 = vmor %vm972_vm6, %vm973_vm5 }
 0x140   : > { %v965_v36 = vsel %vm964_vm4, %v2040_v26, %v961_v33  ;;  %v968_v37 = vmul.f32 %v2042_v32, %v967_v34 }
 0x141   : > { %v976_v39 = vmul.f32 %v965_v36, %v942_v13 }
 0x142   : > { %v969_v40 = vmul.f32 0.5, %v968_v37 }
 0x143   : > { %v981_v41 = vmul.f32 %v2035_v35, %v976_v39 }
 0x144   : > { %v970_v42 = vsub.f32 1.5, %v969_v40 }
 0x145   : > { %v986_v43 = vadd.f32 %v2036_v38, %v981_v41 }
 0x146   : > { %v971_v44 = vmul.f32 %v2042_v32, %v970_v42 }
 0x147   : > { %988 = vst.msk [vmem:[#allocation2] sm:$0xff] %vm926_vm0, %v986_v43 }
 0x148   : > { %v975_v45 = vsel %vm974_vm7, %v2042_v32, %v971_v44 }
 0x149   : > { %v977_v46 = vmul.f32 %v975_v45, %v943_v18 }
 0x14b   : > { %v982_v47 = vmul.f32 %v2035_v35, %v977_v46 }
 0x14d   : > { %v987_v48 = vadd.f32 %v2036_v38, %v982_v47 }
 0x14f   : > { %989 = vst.msk [vmem:[#allocation2 + $0x8] sm:$0xff] %vm926_vm0, %v987_v48 }
 0x150 PF: > { %s2644_s25 = sld [smem:[#allocation5_spill]]  ;;  %v2329_v57 = vld [vmem:[#allocation2] sm:$0xff]  ;;  %vm1006_vm8 = vcmask 523264   ;;  %vm1106_vm9 = vcmask 261120   ;;  %v1078_v13 = vld [vmem:[%s2251_s1 + $0x38] sm:$0xff]  ;;  %v1077_v14 = vld [vmem:[%s2251_s1 + $0x30] sm:$0xff]  ;;  %s2649_s8 = scalar_lea.vmem %s2592_s12, %s2224_s29 }
 0x151   : > { %s2645_s26 = sld [smem:[#allocation7_spill]]  ;;  %v2044_v6 = vld [vmem:[%s2246_s28] ss:$0 sm:$0xff]  ;;  %1091 = vmatpush.msra.mxu2 %v1078_v13  ;;  %v1076_v15 = vld [vmem:[%s2251_s1 + $0x28] sm:$0xff]  ;;  %v1074_v20 = vld [vmem:[%s2251_s1 + $0x18] sm:$0xff]  ;;  %vm1142_vm10 = vcmask 130048  }
 0x152   : > { %s2646_s2 = sld [smem:[#allocation6_spill]]  ;;  %v1075_v18 = vld [vmem:[%s2251_s1 + $0x20] sm:$0xff]  ;;  %v1073_v22 = vld [vmem:[%s2251_s1 + $0x10] sm:$0xff]  ;;  %v1072_v24 = vld [vmem:[%s2251_s1 + $0x8] sm:$0xff] }
 0x153   : > { %1092 = vmatpush.msra.mxu2 %v1077_v14  ;;  %v1071_v26 = vld [vmem:[%s2251_s1] sm:$0xff]  ;;  %s2647_s14 = sld [smem:[#allocation11_spill]]  ;;  %v1980_v13 = vld [vmem:[%s2251_s1 + $0x48] sm:$0xff] }
 0x154   : > { %v1979_v14 = vld [vmem:[%s2251_s1 + $0x40] sm:$0xff] }
 0x155   : > { %1093 = vmatpush.msra.mxu2 %v1076_v15 }
 0x156   : > { %v1001_v49 = vld [vmem:[%s2644_s25 + $0x38] sm:$0xff]  ;;  %v1000_v50 = vld [vmem:[%s2644_s25 + $0x30] sm:$0xff]  ;;  %v999_v51 = vld [vmem:[%s2644_s25 + $0x28] sm:$0xff] }
 0x157   : > { %1021 = vmatpush.msra.mxu1 %v1001_v49  ;;  %v998_v52 = vld [vmem:[%s2644_s25 + $0x20] sm:$0xff]  ;;  %v997_v53 = vld [vmem:[%s2644_s25 + $0x18] sm:$0xff]  ;;  %v996_v54 = vld [vmem:[%s2644_s25 + $0x10] sm:$0xff]  ;;  %1094 = vmatpush.msra.mxu2 %v1075_v18 }
 0x158   : > { %v995_v55 = vld [vmem:[%s2644_s25 + $0x8] sm:$0xff]  ;;  %v994_v56 = vld [vmem:[%s2644_s25] sm:$0xff]  ;;  %v1043_v58 = vld [vmem:[%s2645_s26 + $0x38] sm:$0xff] }
 0x159   : > { %1022 = vmatpush.msra.mxu1 %v1000_v50  ;;  %v1042_v59 = vld [vmem:[%s2645_s26 + $0x30] sm:$0xff]  ;;  %v1041_v60 = vld [vmem:[%s2645_s26 + $0x28] sm:$0xff]  ;;  %v1040_v61 = vld [vmem:[%s2645_s26 + $0x20] sm:$0xff]  ;;  %1095 = vmatpush.msra.mxu2 %v1074_v20 }
 0x15a   : > { %v2337_v62 = vld [vmem:[#allocation2 + $0x8] sm:$0xff]  ;;  %v1039_v63 = vld [vmem:[%s2645_s26 + $0x18] sm:$0xff]  ;;  %v1038_v0 = vld [vmem:[%s2645_s26 + $0x10] sm:$0xff] }
 0x15b   : > { %1023 = vmatpush.msra.mxu1 %v999_v51  ;;  %v1037_v1 = vld [vmem:[%s2645_s26 + $0x8] sm:$0xff]  ;;  %v1036_v2 = vld [vmem:[%s2645_s26] sm:$0xff]  ;;  %v1975_v16 = vld [vmem:[%s2645_s26 + $0x78] sm:$0xff]  ;;  %1096 = vmatpush.msra.mxu2 %v1073_v22 }
 0x15c   : > { %v2043_v9 = vld [vmem:[%s2646_s2] ss:$0 sm:$0xff]  ;;  %v1974_v17 = vld [vmem:[%s2645_s26 + $0x70] sm:$0xff]  ;;  %v1973_v19 = vld [vmem:[%s2645_s26 + $0x68] sm:$0xff] }
 0x15d   : > { %1024 = vmatpush.msra.mxu1 %v998_v52  ;;  %v1972_v21 = vld [vmem:[%s2645_s26 + $0x60] sm:$0xff]  ;;  %v1971_v23 = vld [vmem:[%s2645_s26 + $0x58] sm:$0xff]  ;;  %v1970_v25 = vld [vmem:[%s2645_s26 + $0x50] sm:$0xff]  ;;  %1097 = vmatpush.msra.mxu2 %v1072_v24 }
 0x15e   : > { %v1969_v27 = vld [vmem:[%s2645_s26 + $0x48] sm:$0xff]  ;;  %v1968_v28 = vld [vmem:[%s2645_s26 + $0x40] sm:$0xff]  ;;  %v1964_v37 = vld [vmem:[%s2644_s25 + $0x78] sm:$0xff] }
 0x15f   : > { %1025 = vmatpush.msra.mxu1 %v997_v53  ;;  %1098 = vmatpush.msra.mxu2 %v1071_v26  ;;  %v2376_v29 = vld [vmem:[%s2647_s14] sm:$0xff]  ;;  %v2387_v33 = vld [vmem:[%s2647_s14 + $0x8] sm:$0xff]  ;;  %v1963_v38 = vld [vmem:[%s2644_s25 + $0x70] sm:$0xff] }
 0x160   : > { %1949 = vmatmul.msk.f32.vlgmr.msra.gmra.mxu2 %vm1006_vm8, %v2329_v57  ;;  %1220 = vmatpush.msra.mxu0 %v1964_v37  ;;  %v1962_v39 = vld [vmem:[%s2644_s25 + $0x68] sm:$0xff]  ;;  %v1961_v40 = vld [vmem:[%s2644_s25 + $0x60] sm:$0xff]  ;;  %v1960_v41 = vld [vmem:[%s2644_s25 + $0x58] sm:$0xff] }
 0x161   : > { %1026 = vmatpush.msra.mxu1 %v996_v54  ;;  %v1959_v42 = vld [vmem:[%s2644_s25 + $0x50] sm:$0xff]  ;;  %v1958_v43 = vld [vmem:[%s2644_s25 + $0x48] sm:$0xff]  ;;  %v1957_v44 = vld [vmem:[%s2644_s25 + $0x40] sm:$0xff]  ;;  %s2650_s25 = scalar_lea.vmem %s2593_s13, %s2224_s29 }
 0x162   : > { %1221 = vmatpush.msra.mxu0 %v1963_v38  ;;  %v1196_v20 = vld [vmem:[%s2266_s20 + $0x10] sm:$0xff] }
 0x163   : > { %1027 = vmatpush.msra.mxu1 %v995_v55  ;;  %v2045_v55 = vld [vmem:[%s2256_s6] ss:$0 sm:$0xff] }
 0x164   : > { %1222 = vmatpush.msra.mxu0 %v1962_v39 }
 0x165   : > { %1028 = vmatpush.msra.mxu1 %v994_v56  ;;  %v2046_v56 = vld [vmem:[%s2246_s28 + $0x1] ss:$0 sm:$0xff] }
 0x166   : > { %1945 = vmatmul.msk.f32.vlgmr.msra.gmra.mxu1 %vm1006_vm8, %v2329_v57  ;;  %1223 = vmatpush.msra.mxu0 %v1961_v40 }
 0x167   : > { %1056 = vmatpush.msrb.mxu1 %v1043_v58 }
 0x168   : > { %1950 = vmatmul.msk.f32.gmra.mxu2 %vm1006_vm8, %v2337_v62  ;;  %1224 = vmatpush.msra.mxu0 %v1960_v41 }
 0x169   : > { %1057 = vmatpush.msrb.mxu1 %v1042_v59 }
 0x16a   : > { %1225 = vmatpush.msra.mxu0 %v1959_v42 }
 0x16b   : > { %1058 = vmatpush.msrb.mxu1 %v1041_v60 }
 0x16c   : > { %1226 = vmatpush.msra.mxu0 %v1958_v43 }
 0x16d   : > { %1059 = vmatpush.msrb.mxu1 %v1040_v61 }
 0x16e   : > { %1946 = vmatmul.msk.f32.gmra.mxu1 %vm1006_vm8, %v2337_v62  ;;  %1227 = vmatpush.msra.mxu0 %v1957_v44 }
 0x16f   : > { %1060 = vmatpush.msrb.mxu1 %v1039_v63  ;;  %1966 = vmatmul.msk.f32.vlgmr.msra.gmra.mxu0 %vm1006_vm8, %v2329_v57 }
 0x171   : > { %1061 = vmatpush.msrb.mxu1 %v1038_v0 }
 0x173   : > { %1062 = vmatpush.msrb.mxu1 %v1037_v1 }
 0x175   : > { %1063 = vmatpush.msrb.mxu1 %v1036_v2 }
 0x176   : > { %1947 = vmatmul.msk.f32.vlgmr.msrb.gmra.mxu1 %vm1006_vm8, %v2329_v57 }
 0x177   : > { %1257 = vmatpush.msra.mxu1 %v1975_v16  ;;  %1967 = vmatmul.msk.f32.gmra.mxu0 %vm1006_vm8, %v2337_v62 }
 0x179   : > { %1258 = vmatpush.msra.mxu1 %v1974_v17  ;;  %v1197_v17 = vld [vmem:[%s2266_s20 + $0x18] sm:$0xff] }
 0x17b   : > { %1259 = vmatpush.msra.mxu1 %v1973_v19  ;;  %v2047_v19 = vld [vmem:[%s2646_s2 + $0x1] ss:$0 sm:$0xff] }
 0x17d   : > { %1260 = vmatpush.msra.mxu1 %v1972_v21  ;;  %v1195_v21 = vld [vmem:[%s2266_s20 + $0x8] sm:$0xff] }
 0x17e   : > { %1948 = vmatmul.msk.f32.gmra.mxu1 %vm1006_vm8, %v2337_v62 }
 0x17f   : > { %1261 = vmatpush.msra.mxu1 %v1971_v23 }
 0x181   : > { %1262 = vmatpush.msra.mxu1 %v1970_v25  ;;  %v1194_v25 = vld [vmem:[%s2266_s20] sm:$0xff] }
 0x183   : > { %1263 = vmatpush.msra.mxu1 %v1969_v27 }
 0x185   : > { %1264 = vmatpush.msra.mxu1 %v1968_v28 }
 0x186   : > { %1977 = vmatmul.msk.f32.vlgmr.msra.gmra.mxu1 %vm1006_vm8, %v2329_v57 }
 0x18e   : > { %1978 = vmatmul.msk.f32.gmra.mxu1 %vm1006_vm8, %v2337_v62 }
 0x1e3   : > { %v1030_v3 = vpop.f32.mrf.mxu1  ;;  %v1100_v50 = vpop.f32.mrf.mxu2 }
 0x1e4   : > { %v1031_v11 = vadd.f32 %v2043_v9, %v1030_v3  ;;  %v1101_v60 = vadd.f32 %v2045_v55, %v1100_v50  ;;  %v1998_v50 = vld [vmem:[%s2266_s20 + $0x30] sm:$0xff] }
 0x1eb   : > { %v1033_v4 = vpop.f32.mrf.mxu1  ;;  %v1103_v59 = vpop.f32.mrf.mxu2 }
 0x1ec   : > { %v1034_v12 = vadd.f32 %v2043_v9, %v1033_v4  ;;  %v1104_v61 = vadd.f32 %v2045_v55, %v1103_v59  ;;  %v1986_v4 = vld [vmem:[%s2251_s1 + $0x78] sm:$0xff]  ;;  %v1229_v18 = vpop.f32.mrf.mxu0 }
 0x1ed   : > { %1294 = vmatpush.msrb.mxu2 %v1986_v4  ;;  %v1230_v22 = vadd.f32 %v2047_v19, %v1229_v18 }
 0x1f3   : > { %v1065_v5 = vpop.f32.mrf.mxu1 }
 0x1f4   : > { %v1066_v10 = vadd.f32 %v2044_v6, %v1065_v5  ;;  %v1985_v5 = vld [vmem:[%s2251_s1 + $0x70] sm:$0xff]  ;;  %v1232_v23 = vpop.f32.mrf.mxu0 }
 0x1f5   : > { %1295 = vmatpush.msrb.mxu2 %v1985_v5  ;;  %v1233_v24 = vadd.f32 %v2047_v19, %v1232_v23 }
 0x1fb   : > { %v1068_v7 = vpop.f32.mrf.mxu1 }
 0x1fc   : > { %v1069_v8 = vadd.f32 %v2044_v6, %v1068_v7  ;;  %v1984_v6 = vld [vmem:[%s2251_s1 + $0x68] sm:$0xff]  ;;  %v1983_v7 = vld [vmem:[%s2251_s1 + $0x60] sm:$0xff] }
 0x1fd   : > { %1296 = vmatpush.msrb.mxu2 %v1984_v6 }
 0x1fe   : > { %1951 = vmatpush.xpose.msk.msra.mxu3 %vm1106_vm9, %v1069_v8 }
 0x1ff   : > { %1297 = vmatpush.msrb.mxu2 %v1983_v7 }
 0x202   : > { %1952 = vmatpush.xpose.msk.msra.mxu3 %vm1106_vm9, %v1066_v10 }
 0x203   : > { %v1266_v48 = vpop.f32.mrf.mxu1 }
 0x204   : > { %v1267_v2 = vadd.f32 %v2046_v56, %v1266_v48 }
 0x205   : > { %1953 = vmatmul.msk.f32.vlgmr.msra.gmra.mxu3 %vm1106_vm9, %v1031_v11  ;;  %v1982_v11 = vld [vmem:[%s2251_s1 + $0x58] sm:$0xff] }
 0x206   : > { %1185 = vmatpush.msrb.mxu3 %v1104_v61  ;;  %1298 = vmatpush.msrb.mxu2 %v1982_v11 }
 0x208   : > { %1186 = vmatpush.msrb.mxu3 %v1101_v60 }
 0x20b   : > { %v1269_v58 = vpop.f32.mrf.mxu1 }
 0x20c   : > { %v1270_v63 = vadd.f32 %v2046_v56, %v1269_v58 }
 0x20d   : > { %1954 = vmatmul.msk.f32.gmra.mxu3 %vm1106_vm9, %v1034_v12  ;;  %v1981_v12 = vld [vmem:[%s2251_s1 + $0x50] sm:$0xff] }
 0x20e   : > { %1990 = vmatpush.xpose.msk.msra.mxu3 %vm1106_vm9, %v1270_v63  ;;  %1299 = vmatpush.msrb.mxu2 %v1981_v12  ;;  %v2096_v12 = vmov 64.0  }
 0x210   : > { %1300 = vmatpush.msrb.mxu2 %v1980_v13 }
 0x212   : > { %1991 = vmatpush.xpose.msk.msra.mxu3 %vm1106_vm9, %v1267_v2  ;;  %1301 = vmatpush.msrb.mxu2 %v1979_v14 }
 0x213   : > { %1988 = vmatmul.msk.f32.vlgmr.msrb.gmra.mxu2 %vm1006_vm8, %v2329_v57 }
 0x214   : > { %1447 = vmatpush.msra.mxu2 %v1197_v17 }
 0x216   : > { %1448 = vmatpush.msra.mxu2 %v1196_v20 }
 0x218   : > { %1449 = vmatpush.msra.mxu2 %v1195_v21 }
 0x21a   : > { %1450 = vmatpush.msra.mxu2 %v1194_v25 }
 0x21b   : > { %1989 = vmatmul.msk.f32.gmra.mxu2 %vm1006_vm8, %v2337_v62 }
 0x288   : > { %v1136_v30 = vpop.f32.mrf.mxu3 }
 0x289   : > { %v1137_v31 = vadd.f32 %v1136_v30, %v2376_v29  ;;  %v2048_v30 = vld [vmem:[%s2256_s6 + $0x1] ss:$0 sm:$0xff]  ;;  %s2648_s6 = scalar_lea.vmem %s2591_s11, %s2224_s29 }
 0x28b   : > { %v1143_v32 = vsel %vm1142_vm10, %v1137_v31, -inf }
 0x28c   : > { %1144 = vmax.xlane.f32.xlu0 %v1143_v32 }
 0x290   : > { %v1139_v34 = vpop.f32.mrf.mxu3 }
 0x291   : > { %v1140_v35 = vadd.f32 %v1139_v34, %v2387_v33 }
 0x293   : > { %v1146_v36 = vsel %vm1142_vm10, %v1140_v35, -inf }
 0x294   : > { %1147 = vmax.xlane.f32.xlu0 %v1146_v36 }
 0x296   : > { %v1303_v28 = vpop.f32.mrf.mxu2 }
 0x29e   : > { %v1306_v32 = vpop.f32.mrf.mxu2 }
 0x29f   : > { %v1307_v36 = vadd.f32 %v2048_v30, %v1306_v32  ;;  %v1532_v32 = vld [vmem:[%s2279_s9 + $0x18] sm:$0xff] }
 0x2a1   : > { %1386 = vmatpush.msrb.mxu0 %v1307_v36  ;;  %v1529_v36 = vld [vmem:[%s2279_s9] sm:$0xff] }
 0x2ff   : > { %v1145_v45 = vpop.xlane.xlu0 %1144 }
 0x300   : > { %v1149_v46 = vsub.f32 %v1137_v31, %v1145_v45 }
 0x302   : > { %v1151_v47 = vmul.f32 1.442695, %v1149_v46 }
 0x304   : > { %2056 = vpow2.f32 %v1151_v47 }
 0x307   : > { %v1148_v49 = vpop.xlane.xlu0 %1147 }
 0x308   : > { %v1150_v51 = vsub.f32 %v1140_v35, %v1148_v49  ;;  %v1304_v35 = vadd.f32 %v2048_v30, %v1303_v28  ;;  %v1999_v49 = vld [vmem:[%s2266_s20 + $0x38] sm:$0xff]  ;;  %v1535_v28 = vld [vmem:[%s2279_s9 + $0x30] sm:$0xff]  ;;  %v1534_v30 = vld [vmem:[%s2279_s9 + $0x28] sm:$0xff] }
 0x309   : > { %1418 = vmatpush.msrb.mxu1 %v1999_v49 }
 0x30a   : > { %v2057_v52 = vpop.eup %2056  ;;  %v1153_v53 = vmul.f32 1.442695, %v1150_v51  ;;  %1387 = vmatpush.msrb.mxu0 %v1304_v35  ;;  %v1997_v51 = vld [vmem:[%s2266_s20 + $0x28] sm:$0xff] }
 0x30b   : > { %v1155_v54 = vsel %vm1142_vm10, %v2057_v52, 0.0  ;;  %1419 = vmatpush.msrb.mxu1 %v1998_v50  ;;  %v1530_v35 = vld [vmem:[%s2279_s9 + $0x8] sm:$0xff] }
 0x30c   : > { %2058 = vpow2.f32 %v1153_v53  ;;  %1156 = vadd.xlane.f32.xlu1 %v1155_v54 }
 0x30d   : > { %1420 = vmatpush.msrb.mxu1 %v1997_v51 }
 0x312   : > { %v2059_v0 = vpop.eup %2058 }
 0x313   : > { %v1158_v1 = vsel %vm1142_vm10, %v2059_v0, 0.0 }
 0x314   : > { %1159 = vadd.xlane.f32.xlu1 %v1158_v1 }
 0x37f   : > { %v1157_v3 = vpop.xlane.xlu1 %1156 }
 0x380   : > { %2060 = vrcp.f32 %v1157_v3 }
 0x386   : > { %v2061_v8 = vpop.eup %2060 }
 0x387   : > { %v1160_v9 = vpop.xlane.xlu1 %1159  ;;  %v1163_v10 = vmul.f32 %v2061_v8, %v2057_v52  ;;  %v1996_v52 = vld [vmem:[%s2266_s20 + $0x20] sm:$0xff] }
 0x388   : > { %2062 = vrcp.f32 %v1160_v9  ;;  %1421 = vmatpush.msrb.mxu1 %v1996_v52 }
 0x389   : > { %1955 = vmatmul.msk.f32.vlgmr.msrb.gmra.mxu3 %vm1142_vm10, %v1163_v10 }
 0x38e   : > { %v2063_v15 = vpop.eup %2062 }
 0x38f   : > { %v1164_v16 = vmul.f32 %v2063_v15, %v2059_v0  ;;  %v2049_v0 = vld [vmem:[%s2648_s6] ss:$0 sm:$0xff] }
 0x391   : > { %1956 = vmatmul.msk.f32.gmra.mxu3 %vm1142_vm10, %v1164_v16 }
 0x399   : > { %1992 = vmatmul.msk.f32.vlgmr.msra.gmra.mxu3 %vm1106_vm9, %v1230_v22 }
 0x3a1   : > { %1993 = vmatmul.msk.f32.gmra.mxu3 %vm1106_vm9, %v1233_v24 }
 0x40c   : > { %v1188_v26 = vpop.f32.mrf.mxu3 }
 0x40d   : > { %2002 = vmatmul.msk.f32.vlgmr.msra.gmra.mxu2 %vm1106_vm9, %v1188_v26 }
 0x414   : > { %v1191_v27 = vpop.f32.mrf.mxu3 }
 0x415   : > { %2003 = vmatmul.msk.f32.gmra.mxu2 %vm1106_vm9, %v1191_v27  ;;  %v1536_v27 = vld [vmem:[%s2279_s9 + $0x38] sm:$0xff] }
 0x416   : > { %1555 = vmatpush.msrb.mxu3 %v1536_v27 }
 0x418   : > { %1556 = vmatpush.msrb.mxu3 %v1535_v28 }
 0x41a   : > { %1557 = vmatpush.msrb.mxu3 %v1534_v30 }
 0x41c   : > { %v1338_v31 = vpop.f32.mrf.mxu3 }
 0x41d   : > { %v1339_v34 = vadd.f32 %v1338_v31, %v2376_v29  ;;  %v1533_v31 = vld [vmem:[%s2279_s9 + $0x20] sm:$0xff] }
 0x41e   : > { %1558 = vmatpush.msrb.mxu3 %v1533_v31 }
 0x41f   : > { %v1344_v37 = vsel %vm1142_vm10, %v1339_v34, -inf }
 0x420   : > { %1345 = vmax.xlane.f32.xlu2 %v1344_v37  ;;  %1559 = vmatpush.msrb.mxu3 %v1532_v32 }
 0x424   : > { %v1341_v38 = vpop.f32.mrf.mxu3 }
 0x425   : > { %v1342_v39 = vadd.f32 %v1341_v38, %v2387_v33 }
 0x427   : > { %v1347_v40 = vsel %vm1142_vm10, %v1342_v39, -inf }
 0x428   : > { %1348 = vmax.xlane.f32.xlu2 %v1347_v40  ;;  %v1603_v40 = vld [vmem:[%s2288_s10 + $0x78] sm:$0xff] }
 0x429   : > { %1608 = vmatpush.msra.mxu0 %v1603_v40 }
 0x490   : > { %v1452_v63 = vpop.f32.mrf.mxu2 }
 0x493   : > { %v1346_v41 = vpop.xlane.xlu2 %1345 }
 0x494   : > { %v1350_v42 = vsub.f32 %v1339_v34, %v1346_v41  ;;  %v1531_v34 = vld [vmem:[%s2279_s9 + $0x10] sm:$0xff] }
 0x495   : > { %1560 = vmatpush.msrb.mxu3 %v1531_v34  ;;  %v1602_v41 = vld [vmem:[%s2288_s10 + $0x70] sm:$0xff] }
 0x496   : > { %v1352_v43 = vmul.f32 1.442695, %v1350_v42  ;;  %v1601_v42 = vld [vmem:[%s2288_s10 + $0x68] sm:$0xff]  ;;  %1609 = vmatpush.msra.mxu0 %v1602_v41  ;;  %v2053_v41 = vld [vmem:[%s911_s0] ss:$0 sm:$0xff] }
 0x497   : > { %1561 = vmatpush.msrb.mxu3 %v1530_v35 }
 0x498   : > { %2064 = vpow2.f32 %v1352_v43  ;;  %v1455_v6 = vpop.f32.mrf.mxu2  ;;  %1610 = vmatpush.msra.mxu0 %v1601_v42 }
 0x499   : > { %1562 = vmatpush.msrb.mxu3 %v1529_v36 }
 0x49b   : > { %v1349_v29 = vpop.xlane.xlu2 %1348 }
 0x49c   : > { %v1351_v44 = vsub.f32 %v1342_v39, %v1349_v29 }
 0x49e   : > { %v2065_v45 = vpop.eup %2064  ;;  %v1354_v46 = vmul.f32 1.442695, %v1351_v44  ;;  %v1600_v44 = vld [vmem:[%s2288_s10 + $0x60] sm:$0xff] }
 0x49f   : > { %v1356_v47 = vsel %vm1142_vm10, %v2065_v45, 0.0  ;;  %1611 = vmatpush.msra.mxu0 %v1600_v44 }
 0x4a0   : > { %2066 = vpow2.f32 %v1354_v46  ;;  %1357 = vadd.xlane.f32.xlu0 %v1356_v47 }
 0x4a6   : > { %v2067_v33 = vpop.eup %2066 }
 0x4a7   : > { %v1359_v48 = vsel %vm1142_vm10, %v2067_v33, 0.0 }
 0x4a8   : > { %1360 = vadd.xlane.f32.xlu1 %v1359_v48 }
 0x513   : > { %v1358_v53 = vpop.xlane.xlu0 %1357 }
 0x514   : > { %2068 = vrcp.f32 %v1358_v53  ;;  %v2050_v53 = vld [vmem:[%s2649_s8] ss:$0 sm:$0xff] }
 0x51a   : > { %v2069_v54 = vpop.eup %2068 }
 0x51b   : > { %v1361_v55 = vpop.xlane.xlu1 %1360  ;;  %v1364_v56 = vmul.f32 %v2069_v54, %v2065_v45 }
 0x51c   : > { %2070 = vrcp.f32 %v1361_v55 }
 0x51d   : > { %1994 = vmatmul.msk.f32.vlgmr.msrb.gmra.mxu0 %vm1142_vm10, %v1364_v56  ;;  %2072 = vrcp.f32 %v2096_v12  ;;  %v1592_v12 = vld [vmem:[%s2288_s10 + $0x20] sm:$0xff] }
 0x522   : > { %v2071_v58 = vpop.eup %2070 }
 0x523   : > { %v1365_v59 = vmul.f32 %v2071_v58, %v2067_v33  ;;  %v2073_v13 = vpop.eup %2072  ;;  %v2051_v58 = vld [vmem:[%s2650_s25] ss:$0 sm:$0xff] }
 0x524   : > { %v1475_v14 = vmul.f32 64.0, %v2073_v13  ;;  %vm1479_vm11 = vweird.f32 %v2073_v13 }
 0x525   : > { %1995 = vmatmul.msk.f32.gmra.mxu0 %vm1142_vm10, %v1365_v59 }
 0x526   : > { %v1476_v15 = vsub.f32 1.0, %v1475_v14  ;;  %v1590_v14 = vld [vmem:[%s2288_s10 + $0x10] sm:$0xff] }
 0x528   : > { %v1477_v16 = vmul.f32 %v2073_v13, %v1476_v15  ;;  %v1589_v15 = vld [vmem:[%s2288_s10 + $0x8] sm:$0xff] }
 0x59a   : > { %v1389_v60 = vpop.f32.mrf.mxu0 }
 0x59b   : > { %2000 = vmatmul.msk.f32.vlgmr.msrb.gmra.mxu1 %vm1106_vm9, %v1389_v60 }
 0x5a2   : > { %v1392_v61 = vpop.f32.mrf.mxu0 }
 0x5a3   : > { %2001 = vmatmul.msk.f32.gmra.mxu1 %vm1106_vm9, %v1392_v61 }
 0x618   : > { %v1423_v1 = vpop.f32.mrf.mxu1 }
 0x619   : > { %v1453_v2 = vadd.f32 %v1452_v63, %v1423_v1 }
 0x61b   : > { %v1462_v3 = vadd.f32 %v2049_v0, %v1453_v2 }
 0x61d   : > { %v1464_v4 = vadd.f32 %v1462_v3, %v2329_v57  ;;  %v1478_v57 = vadd.f32 %v2073_v13, %v1477_v16  ;;  %v1588_v16 = vld [vmem:[%s2288_s10] sm:$0xff] }
 0x61f   : > { %v1468_v5 = vsel %vm1006_vm8, %v1464_v4, 0.0  ;;  %v2458_v17 = vsel %vm1479_vm11, %v2073_v13, %v1478_v57  ;;  %v1591_v13 = vld [vmem:[%s2288_s10 + $0x18] sm:$0xff]  ;;  %v2052_v57 = vld [vmem:[%s903_s3] ss:$0 sm:$0xff] }
 0x620   : > { %1469 = vadd.xlane.f32.xlu2 %v1468_v5  ;;  %v1426_v7 = vpop.f32.mrf.mxu1  ;;  %v1599_v5 = vld [vmem:[%s2288_s10 + $0x58] sm:$0xff] }
 0x621   : > { %v1456_v8 = vadd.f32 %v1455_v6, %v1426_v7  ;;  %1612 = vmatpush.msra.mxu0 %v1599_v5  ;;  %v1598_v6 = vld [vmem:[%s2288_s10 + $0x50] sm:$0xff]  ;;  %v1597_v7 = vld [vmem:[%s2288_s10 + $0x48] sm:$0xff] }
 0x623   : > { %v1463_v9 = vadd.f32 %v2049_v0, %v1456_v8  ;;  %1613 = vmatpush.msra.mxu0 %v1598_v6  ;;  %v1596_v8 = vld [vmem:[%s2288_s10 + $0x40] sm:$0xff] }
 0x625   : > { %v1465_v10 = vadd.f32 %v1463_v9, %v2337_v62  ;;  %1614 = vmatpush.msra.mxu0 %v1597_v7  ;;  %v1595_v9 = vld [vmem:[%s2288_s10 + $0x38] sm:$0xff] }
 0x627   : > { %v1471_v11 = vsel %vm1006_vm8, %v1465_v10, 0.0  ;;  %1615 = vmatpush.msra.mxu0 %v1596_v8 }
 0x628   : > { %1472 = vadd.xlane.f32.xlu0 %v1471_v11  ;;  %v1593_v11 = vld [vmem:[%s2288_s10 + $0x28] sm:$0xff] }
 0x629   : > { %1616 = vmatpush.msra.mxu0 %v1595_v9 }
 0x693   : > { %v1470_v18 = vpop.xlane.xlu2 %1469 }
 0x694   : > { %v1481_v19 = vmul.f32 %v2458_v17, %v1470_v18 }
 0x696   : > { %v1483_v62 = vsub.f32 %v1464_v4, %v1481_v19 }
 0x698   : > { %v1485_v20 = vmul.f32 %v1483_v62, %v1483_v62 }
 0x69a   : > { %v1487_v21 = vsel %vm1006_vm8, %v1485_v20, 0.0 }
 0x69b   : > { %v1473_v22 = vpop.xlane.xlu0 %1472  ;;  %1488 = vadd.xlane.f32.xlu1 %v1487_v21 }
 0x69c   : > { %v1482_v23 = vmul.f32 %v2458_v17, %v1473_v22 }
 0x69e   : > { %v2463_v24 = vsub.f32 %v1465_v10, %v1482_v23  ;;  %v1594_v10 = vld [vmem:[%s2288_s10 + $0x30] sm:$0xff] }
 0x69f   : > { %1617 = vmatpush.msra.mxu0 %v1594_v10  ;;  %v2054_v10 = vld [vmem:[%s914_s5] ss:$0 sm:$0xff]  ;;  %s2651_s5 = sld [smem:[#allocation4_spill]] }
 0x6a0   : > { %v1486_v25 = vmul.f32 %v2463_v24, %v2463_v24 }
 0x6a1   : > { %1618 = vmatpush.msra.mxu0 %v1593_v11 }
 0x6a2   : > { %v1490_v26 = vsel %vm1006_vm8, %v1486_v25, 0.0 }
 0x6a3   : > { %1491 = vadd.xlane.f32.xlu2 %v1490_v26  ;;  %1619 = vmatpush.msra.mxu0 %v1592_v12  ;;  %v2055_v12 = vld [vmem:[%s917_s24] ss:$0 sm:$0xff] }
 0x6a5   : > { %1620 = vmatpush.msra.mxu0 %v1591_v13  ;;  %p2006_p5 = scmp.ne.s32.totalorder %s2651_s5, 1 }
 0x6a6   : > { %s2652_s21 = sld [smem:[#allocation20_spill]] (!%p2006_p5) }
 0x6a7   : > { %1621 = vmatpush.msra.mxu0 %v1590_v14  ;;  %s2653_s7 = sld [smem:[#allocation21_spill]] (!%p2006_p5) }
 0x6a8   : > { %s2654_s24 = sld [smem:[#allocation22_spill]] (!%p2006_p5) }
 0x6a9   : > { %1622 = vmatpush.msra.mxu0 %v1589_v15 }
 0x6ab   : > { %1623 = vmatpush.msra.mxu0 %v1588_v16 }
 0x70e   : > { %v1489_v37 = vpop.xlane.xlu1 %1488 }
 0x70f   : > { %v1493_v38 = vmul.f32 %v1489_v37, %v2458_v17 }
 0x711   : > { %v1495_v39 = vadd.f32 1e-12, %v1493_v38 }
 0x713   : > { %2074 = vrsqrt.f32 %v1495_v39  ;;  %vm1503_vm13 = vweird.f32 %v1495_v39 }
 0x716   : > { %v1492_v43 = vpop.xlane.xlu2 %1491 }
 0x717   : > { %v1494_v29 = vmul.f32 %v1492_v43, %v2458_v17 }
 0x719   : > { %v2075_v45 = vpop.eup %2074  ;;  %v1496_v46 = vadd.f32 1e-12, %v1494_v29 }
 0x71a   : > { %v1498_v47 = vmul.f32 %v2075_v45, %v1495_v39  ;;  %vm1504_vm12 = vweird.f32 %v2075_v45 }
 0x71b   : > { %2076 = vrsqrt.f32 %v1496_v46  ;;  %vm1505_vm14 = vmor %vm1503_vm13, %vm1504_vm12  ;;  %vm1513_vm0 = vweird.f32 %v1496_v46 }
 0x71c   : > { %v1499_v33 = vmul.f32 %v2075_v45, %v1498_v47 }
 0x71e   : > { %v1500_v48 = vmul.f32 0.5, %v1499_v33 }
 0x720   : > { %v1501_v49 = vsub.f32 1.5, %v1500_v48 }
 0x721   : > { %v2077_v50 = vpop.eup %2076 }
 0x722   : > { %v1502_v51 = vmul.f32 %v2075_v45, %v1501_v49  ;;  %v1508_v52 = vmul.f32 %v2077_v50, %v1496_v46  ;;  %vm1514_vm15 = vweird.f32 %v2077_v50 }
 0x723   : > { %vm1515_vm1 = vmor %vm1513_vm0, %vm1514_vm15 }
 0x724   : > { %v1506_v54 = vsel %vm1505_vm14, %v2075_v45, %v1502_v51  ;;  %v1509_v55 = vmul.f32 %v2077_v50, %v1508_v52 }
 0x725   : > { %v1517_v56 = vmul.f32 %v1506_v54, %v1483_v62 }
 0x726   : > { %v1510_v59 = vmul.f32 0.5, %v1509_v55 }
 0x727   : > { %v1522_v60 = vmul.f32 %v2050_v53, %v1517_v56 }
 0x728   : > { %v1511_v61 = vsub.f32 1.5, %v1510_v59 }
 0x729   : > { %v2492_v63 = vadd.f32 %v2051_v58, %v1522_v60 }
 0x72a   : > { %v1512_v0 = vmul.f32 %v2077_v50, %v1511_v61 }
 0x72b   : > { %2004 = vmatmul.msk.f32.vlgmr.msrb.gmra.mxu3 %vm1006_vm8, %v2492_v63 }
 0x72c   : > { %v1516_v1 = vsel %vm1515_vm1, %v2077_v50, %v1512_v0 }
 0x72d   : > { %v1518_v2 = vmul.f32 %v1516_v1, %v2463_v24 }
 0x72f   : > { %v1523_v3 = vmul.f32 %v2050_v53, %v1518_v2 }
 0x731   : > { %v1528_v4 = vadd.f32 %v2051_v58, %v1523_v3 }
 0x733   : > { %2005 = vmatmul.msk.f32.gmra.mxu3 %vm1006_vm8, %v1528_v4 }
 0x7ae   : > { %v1564_v18 = vpop.f32.mrf.mxu3 }
 0x7af   : > { %v1565_v19 = vadd.f32 %v2052_v57, %v1564_v18 }
 0x7b1   : > { %v1572_v62 = vmul.f32 0.044715, %v1565_v19  ;;  %v1570_v34 = vmul.f32 0.5, %v1565_v19 }
 0x7b3   : > { %v1574_v20 = vmul.f32 %v1572_v62, %v1565_v19 }
 0x7b5   : > { %v1576_v21 = vmul.f32 %v1574_v20, %v1565_v19 }
 0x7b6   : > { %v1567_v22 = vpop.f32.mrf.mxu3 }
 0x7b7   : > { %v1568_v23 = vadd.f32 %v2052_v57, %v1567_v22  ;;  %v1578_v24 = vadd.f32 %v1576_v21, %v1565_v19 }
 0x7b9   : > { %v1580_v25 = vmul.f32 0.7978846, %v1578_v24  ;;  %v1573_v26 = vmul.f32 0.044715, %v1568_v23  ;;  %v1571_v38 = vmul.f32 0.5, %v1568_v23 }
 0x7bb   : > { %2078 = vtanh.f32 %v1580_v25  ;;  %v1575_v27 = vmul.f32 %v1573_v26, %v1568_v23 }
 0x7bd   : > { %v1577_v28 = vmul.f32 %v1575_v27, %v1568_v23 }
 0x7bf   : > { %v1579_v30 = vadd.f32 %v1577_v28, %v1568_v23 }
 0x7c1   : > { %v2079_v31 = vpop.eup %2078  ;;  %v1581_v32 = vmul.f32 0.7978846, %v1579_v30 }
 0x7c2   : > { %v1584_v35 = vadd.f32 1.0, %v2079_v31 }
 0x7c3   : > { %2080 = vtanh.f32 %v1581_v32 }
 0x7c4   : > { %v1586_v36 = vmul.f32 %v1584_v35, %v1570_v34 }
 0x7c6   : > { %1624 = vmatmul.f32.vlgmr.msra.gmra.mxu0 %v1586_v36 }
 0x7c9   : > { %v2081_v37 = vpop.eup %2080 }
 0x7ca   : > { %v1585_v39 = vadd.f32 1.0, %v2081_v37 }
 0x7cc   : > { %v1587_v40 = vmul.f32 %v1585_v39, %v1571_v38 }
 0x7ce   : > { %1627 = vmatmul.f32.gmra.mxu0 %v1587_v40 }
 0x843   : > { %v1625_v42 = vpop.f32.mrf.mxu0 }
 0x844   : > { %v1626_v43 = vadd.f32 %v2053_v41, %v1625_v42 }
 0x846   : > { %v1631_v29 = vadd.f32 %v1626_v43, %v2492_v63 }
 0x848   : > { %v1635_v44 = vsel %vm1006_vm8, %v1631_v29, 0.0 }
 0x849   : > { %1636 = vadd.xlane.f32.xlu0 %v1635_v44 }
 0x84b   : > { %v1628_v45 = vpop.f32.mrf.mxu0 }
 0x84c   : > { %v1629_v46 = vadd.f32 %v2053_v41, %v1628_v45 }
 0x84e   : > { %v1632_v47 = vadd.f32 %v1629_v46, %v1528_v4 }
 0x850   : > { %v1638_v33 = vsel %vm1006_vm8, %v1632_v47, 0.0 }
 0x851   : > { %1639 = vadd.xlane.f32.xlu1 %v1638_v33 }
 0x8bc   : > { %v1637_v48 = vpop.xlane.xlu0 %1636 }
 0x8bd   : > { %v1641_v49 = vmul.f32 %v1637_v48, %v2458_v17 }
 0x8bf   : > { %v1643_v50 = vsub.f32 %v1631_v29, %v1641_v49 }
 0x8c1   : > { %v1645_v51 = vmul.f32 %v1643_v50, %v1643_v50 }
 0x8c3   : > { %v1647_v52 = vsel %vm1006_vm8, %v1645_v51, 0.0 }
 0x8c4   : > { %1648 = vadd.xlane.f32.xlu2 %v1647_v52  ;;  %v1640_v53 = vpop.xlane.xlu1 %1639 }
 0x8c5   : > { %v1642_v54 = vmul.f32 %v1640_v53, %v2458_v17 }
 0x8c7   : > { %v1644_v55 = vsub.f32 %v1632_v47, %v1642_v54 }
 0x8c9   : > { %v1646_v56 = vmul.f32 %v1644_v55, %v1644_v55 }
 0x8cb   : > { %v1650_v58 = vsel %vm1006_vm8, %v1646_v56, 0.0 }
 0x8cc   : > { %1651 = vadd.xlane.f32.xlu0 %v1650_v58 }
 0x937   : > { %v1649_v59 = vpop.xlane.xlu2 %1648 }
 0x938   : > { %v1653_v60 = vmul.f32 %v1649_v59, %v2458_v17 }
 0x93a   : > { %v1655_v61 = vadd.f32 1e-12, %v1653_v60 }
 0x93c   : > { %2082 = vrsqrt.f32 %v1655_v61  ;;  %vm1663_vm3 = vweird.f32 %v1655_v61 }
 0x93f   : > { %v1652_v63 = vpop.xlane.xlu0 %1651 }
 0x940   : > { %v1654_v0 = vmul.f32 %v1652_v63, %v2458_v17 }
 0x942   : > { %v2083_v1 = vpop.eup %2082  ;;  %v1656_v2 = vadd.f32 1e-12, %v1654_v0 }
 0x943   : > { %v1658_v3 = vmul.f32 %v2083_v1, %v1655_v61  ;;  %vm1664_vm2 = vweird.f32 %v2083_v1 }
 0x944   : > { %2084 = vrsqrt.f32 %v1656_v2  ;;  %vm1665_vm4 = vmor %vm1663_vm3, %vm1664_vm2  ;;  %vm1673_vm6 = vweird.f32 %v1656_v2 }
 0x945   : > { %v1659_v4 = vmul.f32 %v2083_v1, %v1658_v3 }
 0x947   : > { %v1660_v5 = vmul.f32 0.5, %v1659_v4 }
 0x949   : > { %v1661_v6 = vsub.f32 1.5, %v1660_v5 }
 0x94a   : > { %v2085_v7 = vpop.eup %2084 }
 0x94b   : > { %v1662_v8 = vmul.f32 %v2083_v1, %v1661_v6  ;;  %v1668_v9 = vmul.f32 %v2085_v7, %v1656_v2  ;;  %vm1674_vm5 = vweird.f32 %v2085_v7 }
 0x94c   : > { %vm1675_vm7 = vmor %vm1673_vm6, %vm1674_vm5 }
 0x94d   : > { %v1666_v17 = vsel %vm1665_vm4, %v2083_v1, %v1662_v8  ;;  %v1669_v11 = vmul.f32 %v2085_v7, %v1668_v9 }
 0x94e   : > { %v1677_v13 = vmul.f32 %v1666_v17, %v1643_v50 }
 0x94f   : > { %v1670_v14 = vmul.f32 0.5, %v1669_v11 }
 0x950   : > { %v1682_v15 = vmul.f32 %v2054_v10, %v1677_v13 }
 0x951   : > { %v1671_v16 = vsub.f32 1.5, %v1670_v14 }
 0x952   : > { %v1687_v57 = vadd.f32 %v2055_v12, %v1682_v15 }
 0x953   : > { %v1672_v18 = vmul.f32 %v2085_v7, %v1671_v16 }
 0x954   : > { %1689 = vst.msk [vmem:[#allocation2] sm:$0xff] %vm1006_vm8, %v1687_v57 }
 0x955   : > { %v1676_v19 = vsel %vm1675_vm7, %v2085_v7, %v1672_v18 }
 0x956   : > { %v1678_v62 = vmul.f32 %v1676_v19, %v1644_v55 }
 0x958   : > { %v1683_v20 = vmul.f32 %v2054_v10, %v1678_v62  ;;  %1694 = sbr.rel (%p2006_p5) target bundleno = 2543 (0x9ef), region = 116 }
 0x95a   : > { %v1688_v21 = vadd.f32 %v2055_v12, %v1683_v20 }
 0x95c   : > { %1690 = vst.msk [vmem:[#allocation2 + $0x8] sm:$0xff] %vm1006_vm8, %v1688_v21 }
 0x95d   : > { %v1702_v22 = vld [vmem:[%s2652_s21 + $0x38] sm:$0xff]  ;;  %v1701_v23 = vld [vmem:[%s2652_s21 + $0x30] sm:$0xff]  ;;  %v1700_v24 = vld [vmem:[%s2652_s21 + $0x28] sm:$0xff] }
 0x95e   : > { %1721 = vmatpush.msra.mxu0 %v1702_v22  ;;  %2017 = vmatpush.msra.mxu1 %v1702_v22  ;;  %v1699_v25 = vld [vmem:[%s2652_s21 + $0x20] sm:$0xff]  ;;  %v1698_v26 = vld [vmem:[%s2652_s21 + $0x18] sm:$0xff]  ;;  %v1697_v27 = vld [vmem:[%s2652_s21 + $0x10] sm:$0xff] }
 0x95f   : > { %v1696_v28 = vld [vmem:[%s2652_s21 + $0x8] sm:$0xff]  ;;  %v1695_v30 = vld [vmem:[%s2652_s21] sm:$0xff] }
 0x960   : > { %1722 = vmatpush.msra.mxu0 %v1701_v23  ;;  %2018 = vmatpush.msra.mxu1 %v1701_v23  ;;  %v2086_v31 = vld [vmem:[%s2653_s7] ss:$0 sm:$0xff] }
 0x962   : > { %1723 = vmatpush.msra.mxu0 %v1700_v24  ;;  %2019 = vmatpush.msra.mxu1 %v1700_v24 }
 0x964   : > { %1724 = vmatpush.msra.mxu0 %v1699_v25  ;;  %2020 = vmatpush.msra.mxu1 %v1699_v25 }
 0x966   : > { %1725 = vmatpush.msra.mxu0 %v1698_v26  ;;  %2021 = vmatpush.msra.mxu1 %v1698_v26 }
 0x968   : > { %1726 = vmatpush.msra.mxu0 %v1697_v27  ;;  %2022 = vmatpush.msra.mxu1 %v1697_v27 }
 0x96a   : > { %1727 = vmatpush.msra.mxu0 %v1696_v28  ;;  %2023 = vmatpush.msra.mxu1 %v1696_v28 }
 0x96c   : > { %1728 = vmatpush.msra.mxu0 %v1695_v30  ;;  %2024 = vmatpush.msra.mxu1 %v1695_v30 }
 0x96d   : > { %2007 = vmatmul.msk.f32.vlgmr.msra.gmra.mxu0 %vm1006_vm8, %v1687_v57  ;;  %2008 = vmatmul.msk.f32.vlgmr.msra.gmra.mxu1 %vm1006_vm8, %v1688_v21 }
 0x9ea   : > { %v1730_v32 = vpop.f32.mrf.mxu0  ;;  %v1733_v34 = vpop.f32.mrf.mxu1 }
 0x9eb   : > { %v1731_v35 = vadd.f32 %v2086_v31, %v1730_v32  ;;  %v1734_v36 = vadd.f32 %v2086_v31, %v1733_v34 }
 0x9ed   : > { %1736 = vst [vmem:[%s2654_s24] sm:$0xff] %v1731_v35 }
 0x9ee   : > { %1737 = vst [vmem:[%s2654_s24 + $0x8] sm:$0xff] %v1734_v36 }
 0x9ef PF: > { %s2655_s6 = sld [smem:[#allocation3_spill]] }
 0x9f5   : > { %s32_s3 = sadd.s32 1, %s2655_s6  }
 0x9f6   : > { %p29_p6 = scmp.ge.s32.totalorder %s32_s3, 4  }
 0x9f8   :  { %31 = sbr.rel (!%p29_p6) target bundleno = 16 (0x10), region = 194 }

</bundles_post_ra>
